<compile_context>
chip_gen: v7x
topology: tpu7x:2x2x1
jax: 0.10.0
libtpu: 0.0.40
codegen_flags: <defaults>
</compile_context>

<pallas_src>
import functools

import jax
import jax.numpy as jnp
from jax import lax
from jax.experimental import pallas as pl
from jax.experimental.pallas import tpu as pltpu


# ---------------------------------------------------------------------------
# Fused forward kernel.
# Argument order: (ids_ref[SMEM], emb_hbm[ANY],
#                  [w_ih_t, w_hh_t, bias] * n_layers, h0, c0, fc_w_t, fc_b,
#                  sig_out, h_n, c_n,                    # outputs
#                  x_buf, h_seq, gx_buf, gather_sem)     # scratch
# ---------------------------------------------------------------------------
def _fused_sentiment_kernel(n_layers, S, B, E, H, O, t_chunk, n_buf,
                            ids_ref, emb_hbm, *refs):
    del E, O  # shapes are carried by the refs
    n_chunks = S // t_chunk
    CB = t_chunk * B

    k = 0
    layer_w = []
    for _ in range(n_layers):
        layer_w.append((refs[k], refs[k + 1], refs[k + 2]))
        k += 3
    h0_ref, c0_ref, fcw_ref, fcb_ref = refs[k:k + 4]
    k += 4
    sig_ref, hN_ref, cN_ref = refs[k:k + 3]
    k += 3
    x_buf, h_seq, gx_buf, gsem = refs[k:k + 4]

    # Hoisted lane mask: gates packed [i, f, o, g] -> sigmoid on first 3H
    # lanes, tanh on the last H lanes (full-vreg EUP work + one select instead
    # of unaligned intra-vreg slices of the raw gates).
    sig_lanes = lax.broadcasted_iota(jnp.int32, (B, 4 * H), 1) < 3 * H

    # ---- 1) Embedding gather: table stays in HBM; per-row DMAs driven by the
    #         SMEM token ids, double-buffered over timesteps. ----------------
    def _issue(t, slot):
        for b in range(B):                        # B is static (small)
            tok = ids_ref[b, t]
            pltpu.make_async_copy(
                emb_hbm.at[pl.ds(tok, 1), :],
                x_buf.at[pl.ds(t * B + b, 1), :],
                gsem.at[slot, b],
            ).start()

    def _wait(t, slot):
        for b in range(B):
            pltpu.make_async_copy(
                emb_hbm.at[pl.ds(0, 1), :],       # src index irrelevant for wait
                x_buf.at[pl.ds(t * B + b, 1), :],
                gsem.at[slot, b],
            ).wait()

    _issue(0, 0)

    def gather_body(t, carry):
        slot = t % 2

        @pl.when(t + 1 < S)
        def _():
            _issue(t + 1, 1 - slot)               # prefetch next timestep's rows

        _wait(t, slot)
        return carry

    lax.fori_loop(0, S, gather_body, 0)

    # ---- 2) LSTM stack (statically unrolled over layers) --------------------
    last_h = None
    for l in range(n_layers):
        wih_ref, whh_ref, b_ref = layer_w[l]
        x_in = x_buf if l == 0 else h_seq
        whh = whh_ref[...]                  # reused every serial step
        write_seq = (l < n_layers - 1)      # last layer's sequence never needed

        # Hoisted input projection, computed one time-chunk at a time into a
        # double-buffered scratch (bounds VMEM; next chunk's big MXU matmul is
        # issued before the current chunk's serial recurrence).
        def proj(chunk, slot, x_in=x_in, wih_ref=wih_ref, b_ref=b_ref):
            x_slab = x_in[pl.ds(chunk * CB, CB), :]
            gx_buf[slot] = (jnp.dot(x_slab, wih_ref[...],
                                    preferred_element_type=jnp.float32)
                            + b_ref[...])

        proj(0, 0)
        h_cur = h0_ref[l]
        c_cur = c0_ref[l]

        for kc in range(n_chunks):
            slot = kc % n_buf
            if kc + 1 < n_chunks:
                proj(kc + 1, (kc + 1) % n_buf)
            base_row = kc * CB

            def step(tl, carry, slot=slot, base_row=base_row, whh=whh,
                     write_seq=write_seq):
                h_prev, c_prev = carry
                gates = gx_buf[slot, pl.ds(tl * B, B), :] + jnp.dot(
                    h_prev, whh, preferred_element_type=jnp.float32)
                act = jnp.where(sig_lanes,
                                jax.nn.sigmoid(gates), jnp.tanh(gates))
                i_g = act[:, 0:H]
                f_g = act[:, H:2 * H]
                o_g = act[:, 2 * H:3 * H]
                g_g = act[:, 3 * H:4 * H]
                c_new = f_g * c_prev + i_g * g_g
                h_new = o_g * jnp.tanh(c_new)
                if write_seq:
                    h_seq[pl.ds(base_row + tl * B, B), :] = h_new
                return (h_new, c_new)

            h_cur, c_cur = lax.fori_loop(0, t_chunk, step, (h_cur, c_cur),
                                         unroll=min(t_chunk, 8))

        hN_ref[l] = h_cur
        cN_ref[l] = c_cur
        last_h = h_cur

    # ---- 3) FC on the last timestep of the top layer only -------------------
    # (nn.Dropout(0.3) is identity at inference; the reference forward returns
    #  raw logits — nn.Sigmoid is defined but never applied.)
    sig_ref[...] = (jnp.dot(last_h, fcw_ref[...],
                            preferred_element_type=jnp.float32)
                    + fcb_ref[...])


# ---------------------------------------------------------------------------
# Helpers
# ---------------------------------------------------------------------------
def _vmem_bytes(shape, itemsize=4):
    """Approximate (8,128)-tile padded VMEM footprint of an f32 array."""
    shape = tuple(int(d) for d in shape)
    if len(shape) == 1:
        shape = (1,) + shape
    lead = 1
    for d in shape[:-2]:
        lead *= d
    rows = -(-shape[-2] // 8) * 8
    cols = -(-shape[-1] // 128) * 128
    return lead * rows * cols * itemsize


def _largest_divisor_leq(n, cap):
    for d in range(min(n, cap), 0, -1):
        if n % d == 0:
            return d
    return 1


# ---------------------------------------------------------------------------
# Wrapper: batch-first token ids (B, S) like PyTorch batch_first=True.
# ---------------------------------------------------------------------------
def sentiment_rnn_forward(kparams, x_tokens, hidden, *, time_chunk=None):
    """x_tokens: (B, S) int32, hidden = (h0, c0) each (n_layers, B, H)."""
    h0, c0 = hidden
    n_layers, B, H = h0.shape
    _, S = x_tokens.shape
    emb = kparams["embedding"]
    _, E = emb.shape
    O = kparams["fc_w_t"].shape[-1]

    if time_chunk is None:
        # Cap the gates_x chunk at 64 timesteps (halve for v7x's 64 MiB VMEM
        # at large B/H if needed).
        time_chunk = _largest_divisor_leq(S, 64)
    assert S % time_chunk == 0, "time_chunk must divide the sequence length"
    n_chunks = S // time_chunk
    n_buf = 2 if n_chunks > 1 else 1
    CB = time_chunk * B

    inputs = [emb]
    in_specs = [pl.BlockSpec(memory_space=pl.ANY)]   # table stays in HBM
    for lp in kparams["lstm"]:
        d_in = lp["w_ih_t"].shape[0]
        inputs += [lp["w_ih_t"], lp["w_hh_t"], lp["bias"]]
        in_specs += [
            pl.BlockSpec((d_in, 4 * H), lambda i, ids: (0, 0)),
            pl.BlockSpec((H, 4 * H), lambda i, ids: (0, 0)),
            pl.BlockSpec((1, 4 * H), lambda i, ids: (0, 0)),
        ]
    inputs += [h0, c0, kparams["fc_w_t"], kparams["fc_b"]]
    in_specs += [
        pl.BlockSpec((n_layers, B, H), lambda i, ids: (0, 0, 0)),
        pl.BlockSpec((n_layers, B, H), lambda i, ids: (0, 0, 0)),
        pl.BlockSpec((H, O), lambda i, ids: (0, 0)),
        pl.BlockSpec((1, O), lambda i, ids: (0, 0)),
    ]

    out_shape = (
        jax.ShapeDtypeStruct((B, O), jnp.float32),
        jax.ShapeDtypeStruct((n_layers, B, H), jnp.float32),
        jax.ShapeDtypeStruct((n_layers, B, H), jnp.float32),
    )
    out_specs = [
        pl.BlockSpec((B, O), lambda i, ids: (0, 0)),
        pl.BlockSpec((n_layers, B, H), lambda i, ids: (0, 0, 0)),
        pl.BlockSpec((n_layers, B, H), lambda i, ids: (0, 0, 0)),
    ]
    scratch_shapes = [
        pltpu.VMEM((S * B, E), jnp.float32),              # gathered layer-0 input
        pltpu.VMEM((S * B, H), jnp.float32),              # inter-layer sequence
        pltpu.VMEM((n_buf, CB, 4 * H), jnp.float32),      # chunked gates_x
        pltpu.SemaphoreType.DMA((2, B)),                  # gather DMA sems
    ]

    # Explicit VMEM budget: scratch + (double-buffered) VMEM inputs + outputs,
    # 2x headroom, capped at 64 MiB so the same budget also fits v7x.
    vmem_budget = 0
    for a in inputs[1:]:                                   # emb stays in HBM
        vmem_budget += 2 * _vmem_bytes(a.shape)
    vmem_budget += 2 * (_vmem_bytes((B, O)) + 2 * _vmem_bytes((n_layers, B, H)))
    vmem_budget += (_vmem_bytes((S * B, E)) + _vmem_bytes((S * B, H))
                    + _vmem_bytes((n_buf, CB, 4 * H)))
    vmem_limit = int(min(64 << 20, max(4 << 20, 2 * vmem_budget)))

    kernel = functools.partial(_fused_sentiment_kernel, n_layers, S, B, E, H, O,
                               time_chunk, n_buf)
    sig, h_n, c_n = pl.pallas_call(
        kernel,
        out_shape=out_shape,
        grid_spec=pltpu.PrefetchScalarGridSpec(
            num_scalar_prefetch=1,               # token ids -> SMEM
            grid=(1,),
            in_specs=in_specs,
            out_specs=out_specs,
            scratch_shapes=scratch_shapes,
        ),
        compiler_params=pltpu.CompilerParams(
            dimension_semantics=("arbitrary",),
            vmem_limit_bytes=vmem_limit,
        ),
    )(x_tokens.astype(jnp.int32), *inputs)
    return sig, (h_n, c_n)


# ---------------------------------------------------------------------------
# Parameter init (PyTorch layout: gate rows i,f,g,o) + kernel-layout packing.
# ---------------------------------------------------------------------------
def init_torch_params(key, vocab_size, output_size, embedding_dim, hidden_dim,
                      n_layers):
    params = {}
    key, k_emb = jax.random.split(key)
    params["embedding"] = jax.random.normal(
        k_emb, (vocab_size, embedding_dim), jnp.float32)

    scale = 1.0 / jnp.sqrt(hidden_dim)
    lstm = []
    for layer in range(n_layers):
        d_in = embedding_dim if layer == 0 else hidden_dim
        key, k1, k2, k3, k4 = jax.random.split(key, 5)
        lstm.append({
            "w_ih": jax.random.uniform(k1, (4 * hidden_dim, d_in),
                                       jnp.float32, -scale, scale),
            "w_hh": jax.random.uniform(k2, (4 * hidden_dim, hidden_dim),
                                       jnp.float32, -scale, scale),
            "b_ih": jax.random.uniform(k3, (4 * hidden_dim,),
                                       jnp.float32, -scale, scale),
            "b_hh": jax.random.uniform(k4, (4 * hidden_dim,),
                                       jnp.float32, -scale, scale),
        })
    params["lstm"] = lstm

    key, k5, k6 = jax.random.split(key, 3)
    params["fc_w"] = jax.random.uniform(k5, (output_size, hidden_dim),
                                        jnp.float32, -scale, scale)
    params["fc_b"] = jax.random.uniform(k6, (output_size,),
                                        jnp.float32, -scale, scale)
    return params


def prepare_kernel_params(tparams):
    """PyTorch layout (i,f,g,o rows) -> kernel layout (i,f,o,g, transposed)."""
    H = tparams["lstm"][0]["w_hh"].shape[1]

    def reorder(w):  # row blocks [i, f, g, o] -> [i, f, o, g]
        return jnp.concatenate(
            [w[0 * H:1 * H], w[1 * H:2 * H], w[3 * H:4 * H], w[2 * H:3 * H]],
            axis=0)

    kp = {"embedding": tparams["embedding"]}
    lstm = []
    for lp in tparams["lstm"]:
        lstm.append({
            "w_ih_t": reorder(lp["w_ih"]).T,                       # (D_in, 4H)
            "w_hh_t": reorder(lp["w_hh"]).T,                       # (H, 4H)
            "bias": reorder(lp["b_ih"] + lp["b_hh"]).reshape(1, 4 * H),
        })
    kp["lstm"] = lstm
    kp["fc_w_t"] = tparams["fc_w"].T                               # (H, O)
    kp["fc_b"] = tparams["fc_b"].reshape(1, -1)                    # (1, O)
    return kp


# ---------------------------------------------------------------------------
# Pure-JAX reference in the original PyTorch layout (gates i,f,g,o;
# FC on all timesteps then [:, -1]) for correctness checking.
# ---------------------------------------------------------------------------
def _reference_forward(tparams, x_tokens, hidden):
    h0_all, c0_all = hidden
    B, S = x_tokens.shape
    embeds = jnp.take(tparams["embedding"], x_tokens, axis=0)      # (B, S, E)
    layer_in = jnp.transpose(embeds, (1, 0, 2))                    # (S, B, E)
    h_list, c_list = [], []
    for layer, lp in enumerate(tparams["lstm"]):
        H = lp["w_hh"].shape[1]
        w_ih_t, w_hh_t = lp["w_ih"].T, lp["w_hh"].T
        bias = lp["b_ih"] + lp["b_hh"]

        def step(carry, xt, w_ih_t=w_ih_t, w_hh_t=w_hh_t, bias=bias, H=H):
            h, c = carry
            gates = xt @ w_ih_t + h @ w_hh_t + bias
            i = jax.nn.sigmoid(gates[:, 0 * H:1 * H])
            f = jax.nn.sigmoid(gates[:, 1 * H:2 * H])
            g = jnp.tanh(gates[:, 2 * H:3 * H])
            o = jax.nn.sigmoid(gates[:, 3 * H:4 * H])
            c = f * c + i * g
            h = o * jnp.tanh(c)
            return (h, c), h

        (h_n, c_n), ys = lax.scan(step, (h0_all[layer], c0_all[layer]), layer_in)
        h_list.append(h_n)
        c_list.append(c_n)
        layer_in = ys
    lstm_out = jnp.transpose(layer_in, (1, 0, 2))                  # (B, S, H)
    flat = lstm_out.reshape(-1, lstm_out.shape[-1])
    out = flat @ tparams["fc_w"].T + tparams["fc_b"]
    sig_out = out.reshape(B, -1, tparams["fc_w"].shape[0])[:, -1]
    return sig_out, (jnp.stack(h_list), jnp.stack(c_list))


if __name__ == "__main__":
    vocab_size = 50
    output_size = 1
    embedding_dim = 32
    hidden_dim = 32
    n_layers = 2
    batch = 2
    seq = 8

    key = jax.random.PRNGKey(0)
    k_params, k_tokens = jax.random.split(key)
    torch_params = init_torch_params(k_params, vocab_size, output_size,
                                     embedding_dim, hidden_dim, n_layers)
    kernel_params = prepare_kernel_params(torch_params)

    x_tokens = jax.random.randint(k_tokens, (batch, seq), 0, vocab_size,
                                  dtype=jnp.int32)
    # init_hidden: zeros
    hidden = (jnp.zeros((n_layers, batch, hidden_dim), jnp.float32),
              jnp.zeros((n_layers, batch, hidden_dim), jnp.float32))

    # time_chunk=4 -> 2 chunks, exercising the double-buffered gates_x path.
    sig_out, (h_n, c_n) = sentiment_rnn_forward(kernel_params, x_tokens, hidden,
                                                time_chunk=4)
    jax.block_until_ready((sig_out, h_n, c_n))

    ref_out, (ref_h, ref_c) = _reference_forward(torch_params, x_tokens, hidden)
    assert sig_out.shape == (batch, output_size)
    assert h_n.shape == (n_layers, batch, hidden_dim)
    assert c_n.shape == (n_layers, batch, hidden_dim)
    assert jnp.allclose(sig_out, ref_out, atol=1e-4), "fc/last-step mismatch"
    assert jnp.allclose(h_n, ref_h, atol=1e-4), "h_n mismatch"
    assert jnp.allclose(c_n, ref_c, atol=1e-4), "c_n mismatch"

    print("KERNEL_OK")
</pallas_src>

<mosaic_0001>
module attributes {stable_mosaic.version = 11 : i64} {
  func.func @_fused_sentiment_kernel(%arg0: i32, %arg1: memref<2x8xi32, #tpu.memory_space<smem>>, %arg2: memref<50x32xf32, #tpu.memory_space<any>>, %arg3: memref<32x128xf32, #tpu.memory_space<vmem>>, %arg4: memref<32x128xf32, #tpu.memory_space<vmem>>, %arg5: memref<1x128xf32, #tpu.memory_space<vmem>>, %arg6: memref<32x128xf32, #tpu.memory_space<vmem>>, %arg7: memref<32x128xf32, #tpu.memory_space<vmem>>, %arg8: memref<1x128xf32, #tpu.memory_space<vmem>>, %arg9: memref<2x2x32xf32, #tpu.memory_space<vmem>>, %arg10: memref<2x2x32xf32, #tpu.memory_space<vmem>>, %arg11: memref<32x1xf32, #tpu.memory_space<vmem>>, %arg12: memref<1x1xf32, #tpu.memory_space<vmem>>, %arg13: memref<2x1xf32, #tpu.memory_space<vmem>>, %arg14: memref<2x2x32xf32, #tpu.memory_space<vmem>>, %arg15: memref<2x2x32xf32, #tpu.memory_space<vmem>>, %arg16: memref<16x32xf32, #tpu.memory_space<vmem>>, %arg17: memref<16x32xf32, #tpu.memory_space<vmem>>, %arg18: memref<2x8x128xf32, #tpu.memory_space<vmem>>, %arg19: memref<2x2x!tpu.dma_semaphore, #tpu.memory_space<semaphore_mem>>) attributes {dimension_semantics = [#tpu.dimension_semantics<arbitrary>], iteration_bounds = array<i64: 1>, scalar_prefetch = 1 : i64, scratch_operands = 4 : i64, tpu.core_type = #tpu.core_type<tc>, window_params = [{}, {pipeline_mode = #tpu.pipeline_mode<synchronous>, transform_indices = @transform_1, window_bounds = array<i64: 32, 128>}, {pipeline_mode = #tpu.pipeline_mode<synchronous>, transform_indices = @transform_2, window_bounds = array<i64: 32, 128>}, {pipeline_mode = #tpu.pipeline_mode<synchronous>, transform_indices = @transform_3, window_bounds = array<i64: 1, 128>}, {pipeline_mode = #tpu.pipeline_mode<synchronous>, transform_indices = @transform_4, window_bounds = array<i64: 32, 128>}, {pipeline_mode = #tpu.pipeline_mode<synchronous>, transform_indices = @transform_5, window_bounds = array<i64: 32, 128>}, {pipeline_mode = #tpu.pipeline_mode<synchronous>, transform_indices = @transform_6, window_bounds = array<i64: 1, 128>}, {pipeline_mode = #tpu.pipeline_mode<synchronous>, transform_indices = @transform_7, window_bounds = array<i64: 2, 2, 32>}, {pipeline_mode = #tpu.pipeline_mode<synchronous>, transform_indices = @transform_8, window_bounds = array<i64: 2, 2, 32>}, {pipeline_mode = #tpu.pipeline_mode<synchronous>, transform_indices = @transform_9, window_bounds = array<i64: 32, 1>}, {pipeline_mode = #tpu.pipeline_mode<synchronous>, transform_indices = @transform_10, window_bounds = array<i64: 1, 1>}, {pipeline_mode = #tpu.pipeline_mode<synchronous>, transform_indices = @transform_11, window_bounds = array<i64: 2, 1>}, {pipeline_mode = #tpu.pipeline_mode<synchronous>, transform_indices = @transform_12, window_bounds = array<i64: 2, 2, 32>}, {pipeline_mode = #tpu.pipeline_mode<synchronous>, transform_indices = @transform_13, window_bounds = array<i64: 2, 2, 32>}]} {
    %0 = tpu.iota {dimensions = array<i32: 1>} : vector<2x128xi32>
    %c96_i32 = arith.constant 96 : i32
    %1 = vector.broadcast %c96_i32 : i32 to vector<2x128xi32>
    %2 = arith.cmpi slt, %0, %1 : vector<2x128xi32>
    %c0 = arith.constant 0 : index
    %c0_0 = arith.constant 0 : index
    %3 = memref.load %arg1[%c0, %c0_0] : memref<2x8xi32, #tpu.memory_space<smem>>
    %c0_i32 = arith.constant 0 : i32
    %c0_i32_1 = arith.constant 0 : i32
    %c0_i32_2 = arith.constant 0 : i32
    %4 = tpu.memref_slice %arg2[%3, %c0_i32_2] : memref<50x32xf32, #tpu.memory_space<any>> -> memref<1x32xf32, #tpu.memory_space<any>>
    %c0_i32_3 = arith.constant 0 : i32
    %c0_i32_4 = arith.constant 0 : i32
    %5 = tpu.memref_slice %arg16[%c0_i32_3, %c0_i32_4] : memref<16x32xf32, #tpu.memory_space<vmem>> -> memref<1x32xf32, #tpu.memory_space<vmem>>
    %6 = tpu.memref_slice %arg19[%c0_i32, %c0_i32_1] : memref<2x2x!tpu.dma_semaphore, #tpu.memory_space<semaphore_mem>> -> memref<1x1x!tpu.dma_semaphore, #tpu.memory_space<semaphore_mem>>
    %7 = tpu.memref_squeeze %6 : memref<1x1x!tpu.dma_semaphore, #tpu.memory_space<semaphore_mem>> -> memref<!tpu.dma_semaphore, #tpu.memory_space<semaphore_mem>>
    tpu.enqueue_dma source(%4 : memref<1x32xf32, #tpu.memory_space<any>>) target(%5 : memref<1x32xf32, #tpu.memory_space<vmem>>) target_semaphore(%7 : memref<!tpu.dma_semaphore, #tpu.memory_space<semaphore_mem>>)
    %c1 = arith.constant 1 : index
    %c0_5 = arith.constant 0 : index
    %8 = memref.load %arg1[%c1, %c0_5] : memref<2x8xi32, #tpu.memory_space<smem>>
    %c0_i32_6 = arith.constant 0 : i32
    %c1_i32 = arith.constant 1 : i32
    %c0_i32_7 = arith.constant 0 : i32
    %9 = tpu.memref_slice %arg2[%8, %c0_i32_7] : memref<50x32xf32, #tpu.memory_space<any>> -> memref<1x32xf32, #tpu.memory_space<any>>
    %c1_i32_8 = arith.constant 1 : i32
    %c0_i32_9 = arith.constant 0 : i32
    %10 = tpu.memref_slice %arg16[%c1_i32_8, %c0_i32_9] : memref<16x32xf32, #tpu.memory_space<vmem>> -> memref<1x32xf32, #tpu.memory_space<vmem>>
    %11 = tpu.memref_slice %arg19[%c0_i32_6, %c1_i32] : memref<2x2x!tpu.dma_semaphore, #tpu.memory_space<semaphore_mem>> -> memref<1x1x!tpu.dma_semaphore, #tpu.memory_space<semaphore_mem>>
    %12 = tpu.memref_squeeze %11 : memref<1x1x!tpu.dma_semaphore, #tpu.memory_space<semaphore_mem>> -> memref<!tpu.dma_semaphore, #tpu.memory_space<semaphore_mem>>
    tpu.enqueue_dma source(%9 : memref<1x32xf32, #tpu.memory_space<any>>) target(%10 : memref<1x32xf32, #tpu.memory_space<vmem>>) target_semaphore(%12 : memref<!tpu.dma_semaphore, #tpu.memory_space<semaphore_mem>>)
    %c0_i32_10 = arith.constant 0 : i32
    %c8_i32 = arith.constant 8 : i32
    %13 = arith.addi %c0_i32_10, %c8_i32 : i32
    %c1_i32_11 = arith.constant 1 : i32
    scf.for %arg20 = %c0_i32_10 to %13 step %c1_i32_11  : i32 {
      %c2_i32_207 = arith.constant 2 : i32
      %c0_i32_208 = arith.constant 0 : i32
      %462 = arith.cmpi eq, %c2_i32_207, %c0_i32_208 : i32
      %c1_i32_209 = arith.constant 1 : i32
      %463 = arith.select %462, %c1_i32_209, %c2_i32_207 : i32
      %464 = arith.remsi %arg20, %463 : i32
      %c0_i32_210 = arith.constant 0 : i32
      %465 = arith.cmpi ne, %464, %c0_i32_210 : i32
      %c0_i32_211 = arith.constant 0 : i32
      %466 = arith.cmpi slt, %464, %c0_i32_211 : i32
      %c0_i32_212 = arith.constant 0 : i32
      %467 = arith.cmpi slt, %463, %c0_i32_212 : i32
      %468 = arith.xori %466, %467 : i1
      %469 = arith.andi %468, %465 : i1
      %470 = arith.addi %464, %463 : i32
      %471 = arith.select %469, %470, %464 : i32
      %c1_i32_213 = arith.constant 1 : i32
      %472 = arith.addi %arg20, %c1_i32_213 : i32
      %c8_i32_214 = arith.constant 8 : i32
      %473 = arith.cmpi slt, %472, %c8_i32_214 : i32
      %474 = arith.extui %473 : i1 to i32
      %c0_i32_215 = arith.constant 0 : i32
      %475 = arith.cmpi ne, %474, %c0_i32_215 : i32
      scf.if %475 {
        %c1_i32_228 = arith.constant 1 : i32
        %488 = arith.addi %arg20, %c1_i32_228 : i32
        %c1_i32_229 = arith.constant 1 : i32
        %489 = arith.subi %c1_i32_229, %471 : i32
        %c0_230 = arith.constant 0 : index
        %490 = arith.index_cast %488 : i32 to index
        %491 = memref.load %arg1[%c0_230, %490] : memref<2x8xi32, #tpu.memory_space<smem>>
        %c2_i32_231 = arith.constant 2 : i32
        %492 = arith.muli %488, %c2_i32_231 : i32
        %c0_i32_232 = arith.constant 0 : i32
        %493 = arith.addi %492, %c0_i32_232 : i32
        %c0_i32_233 = arith.constant 0 : i32
        %c0_i32_234 = arith.constant 0 : i32
        %494 = tpu.memref_slice %arg2[%491, %c0_i32_234] : memref<50x32xf32, #tpu.memory_space<any>> -> memref<1x32xf32, #tpu.memory_space<any>>
        %c0_i32_235 = arith.constant 0 : i32
        %495 = tpu.memref_slice %arg16[%493, %c0_i32_235] : memref<16x32xf32, #tpu.memory_space<vmem>> -> memref<1x32xf32, #tpu.memory_space<vmem>>
        %496 = tpu.memref_slice %arg19[%489, %c0_i32_233] : memref<2x2x!tpu.dma_semaphore, #tpu.memory_space<semaphore_mem>> -> memref<1x1x!tpu.dma_semaphore, #tpu.memory_space<semaphore_mem>>
        %497 = tpu.memref_squeeze %496 : memref<1x1x!tpu.dma_semaphore, #tpu.memory_space<semaphore_mem>> -> memref<!tpu.dma_semaphore, #tpu.memory_space<semaphore_mem>>
        tpu.enqueue_dma source(%494 : memref<1x32xf32, #tpu.memory_space<any>>) target(%495 : memref<1x32xf32, #tpu.memory_space<vmem>>) target_semaphore(%497 : memref<!tpu.dma_semaphore, #tpu.memory_space<semaphore_mem>>)
        %c1_236 = arith.constant 1 : index
        %498 = arith.index_cast %488 : i32 to index
        %499 = memref.load %arg1[%c1_236, %498] : memref<2x8xi32, #tpu.memory_space<smem>>
        %c2_i32_237 = arith.constant 2 : i32
        %500 = arith.muli %488, %c2_i32_237 : i32
        %c1_i32_238 = arith.constant 1 : i32
        %501 = arith.addi %500, %c1_i32_238 : i32
        %c1_i32_239 = arith.constant 1 : i32
        %c0_i32_240 = arith.constant 0 : i32
        %502 = tpu.memref_slice %arg2[%499, %c0_i32_240] : memref<50x32xf32, #tpu.memory_space<any>> -> memref<1x32xf32, #tpu.memory_space<any>>
        %c0_i32_241 = arith.constant 0 : i32
        %503 = tpu.memref_slice %arg16[%501, %c0_i32_241] : memref<16x32xf32, #tpu.memory_space<vmem>> -> memref<1x32xf32, #tpu.memory_space<vmem>>
        %504 = tpu.memref_slice %arg19[%489, %c1_i32_239] : memref<2x2x!tpu.dma_semaphore, #tpu.memory_space<semaphore_mem>> -> memref<1x1x!tpu.dma_semaphore, #tpu.memory_space<semaphore_mem>>
        %505 = tpu.memref_squeeze %504 : memref<1x1x!tpu.dma_semaphore, #tpu.memory_space<semaphore_mem>> -> memref<!tpu.dma_semaphore, #tpu.memory_space<semaphore_mem>>
        tpu.enqueue_dma source(%502 : memref<1x32xf32, #tpu.memory_space<any>>) target(%503 : memref<1x32xf32, #tpu.memory_space<vmem>>) target_semaphore(%505 : memref<!tpu.dma_semaphore, #tpu.memory_space<semaphore_mem>>)
      } else {
      }
      %c2_i32_216 = arith.constant 2 : i32
      %476 = arith.muli %arg20, %c2_i32_216 : i32
      %c0_i32_217 = arith.constant 0 : i32
      %477 = arith.addi %476, %c0_i32_217 : i32
      %c0_i32_218 = arith.constant 0 : i32
      %c0_i32_219 = arith.constant 0 : i32
      %c0_i32_220 = arith.constant 0 : i32
      %478 = tpu.memref_slice %arg2[%c0_i32_219, %c0_i32_220] : memref<50x32xf32, #tpu.memory_space<any>> -> memref<1x32xf32, #tpu.memory_space<any>>
      %c0_i32_221 = arith.constant 0 : i32
      %479 = tpu.memref_slice %arg16[%477, %c0_i32_221] : memref<16x32xf32, #tpu.memory_space<vmem>> -> memref<1x32xf32, #tpu.memory_space<vmem>>
      %480 = tpu.memref_slice %arg19[%471, %c0_i32_218] : memref<2x2x!tpu.dma_semaphore, #tpu.memory_space<semaphore_mem>> -> memref<1x1x!tpu.dma_semaphore, #tpu.memory_space<semaphore_mem>>
      %481 = tpu.memref_squeeze %480 : memref<1x1x!tpu.dma_semaphore, #tpu.memory_space<semaphore_mem>> -> memref<!tpu.dma_semaphore, #tpu.memory_space<semaphore_mem>>
      tpu.wait_dma2 semaphore(%481 : memref<!tpu.dma_semaphore, #tpu.memory_space<semaphore_mem>>) src(%478 : memref<1x32xf32, #tpu.memory_space<any>>) dst(%479 : memref<1x32xf32, #tpu.memory_space<vmem>>)
      %c2_i32_222 = arith.constant 2 : i32
      %482 = arith.muli %arg20, %c2_i32_222 : i32
      %c1_i32_223 = arith.constant 1 : i32
      %483 = arith.addi %482, %c1_i32_223 : i32
      %c1_i32_224 = arith.constant 1 : i32
      %c0_i32_225 = arith.constant 0 : i32
      %c0_i32_226 = arith.constant 0 : i32
      %484 = tpu.memref_slice %arg2[%c0_i32_225, %c0_i32_226] : memref<50x32xf32, #tpu.memory_space<any>> -> memref<1x32xf32, #tpu.memory_space<any>>
      %c0_i32_227 = arith.constant 0 : i32
      %485 = tpu.memref_slice %arg16[%483, %c0_i32_227] : memref<16x32xf32, #tpu.memory_space<vmem>> -> memref<1x32xf32, #tpu.memory_space<vmem>>
      %486 = tpu.memref_slice %arg19[%471, %c1_i32_224] : memref<2x2x!tpu.dma_semaphore, #tpu.memory_space<semaphore_mem>> -> memref<1x1x!tpu.dma_semaphore, #tpu.memory_space<semaphore_mem>>
      %487 = tpu.memref_squeeze %486 : memref<1x1x!tpu.dma_semaphore, #tpu.memory_space<semaphore_mem>> -> memref<!tpu.dma_semaphore, #tpu.memory_space<semaphore_mem>>
      tpu.wait_dma2 semaphore(%487 : memref<!tpu.dma_semaphore, #tpu.memory_space<semaphore_mem>>) src(%484 : memref<1x32xf32, #tpu.memory_space<any>>) dst(%485 : memref<1x32xf32, #tpu.memory_space<vmem>>)
    }
    %c8_i32_12 = arith.constant 8 : i32
    %c0_13 = arith.constant 0 : index
    %c0_14 = arith.constant 0 : index
    %14 = vector.load %arg4[%c0_13, %c0_14] : memref<32x128xf32, #tpu.memory_space<vmem>>, vector<32x128xf32>
    %c0_15 = arith.constant 0 : index
    %c0_16 = arith.constant 0 : index
    %15 = vector.load %arg16[%c0_15, %c0_16] : memref<16x32xf32, #tpu.memory_space<vmem>>, vector<8x32xf32>
    %c0_17 = arith.constant 0 : index
    %c0_18 = arith.constant 0 : index
    %16 = vector.load %arg3[%c0_17, %c0_18] : memref<32x128xf32, #tpu.memory_space<vmem>>, vector<32x128xf32>
    %cst = arith.constant dense<0.000000e+00> : vector<8x128xf32>
    %17 = tpu.matmul %15, %16, %cst {dimension_numbers = #tpu.dot_dimension_numbers<[1], [0], [0], [1], [0, 0, 1, 1], [], []>} : vector<8x32xf32>, vector<32x128xf32>, vector<8x128xf32> -> vector<8x128xf32>
    %c0_19 = arith.constant 0 : index
    %c0_20 = arith.constant 0 : index
    %18 = vector.load %arg5[%c0_19, %c0_20] : memref<1x128xf32, #tpu.memory_space<vmem>>, vector<1x128xf32>
    %19 = vector.broadcast %18 : vector<1x128xf32> to vector<8x128xf32>
    %20 = arith.addf %17, %19 : vector<8x128xf32>
    %c0_21 = arith.constant 0 : index
    %c0_22 = arith.constant 0 : index
    %c0_23 = arith.constant 0 : index
    %21 = vector.load %arg18[%c0_21, %c0_22, %c0_23] : memref<2x8x128xf32, #tpu.memory_space<vmem>>, vector<1x8x128xf32>
    %22 = vector.shape_cast %21 : vector<1x8x128xf32> to vector<8x128xf32>
    %23 = vector.shape_cast %20 : vector<8x128xf32> to vector<1x8x128xf32>
    tpu.vector_store %arg18[%c0_21, %c0_22, %c0_23], %23 {strides = array<i32>} : memref<2x8x128xf32, #tpu.memory_space<vmem>>, vector<1x8x128xf32>,
    %c0_24 = arith.constant 0 : index
    %c0_25 = arith.constant 0 : index
    %c0_26 = arith.constant 0 : index
    %24 = vector.load %arg9[%c0_24, %c0_25, %c0_26] : memref<2x2x32xf32, #tpu.memory_space<vmem>>, vector<1x2x32xf32>
    %25 = vector.shape_cast %24 : vector<1x2x32xf32> to vector<2x32xf32>
    %c0_27 = arith.constant 0 : index
    %c0_28 = arith.constant 0 : index
    %c0_29 = arith.constant 0 : index
    %26 = vector.load %arg10[%c0_27, %c0_28, %c0_29] : memref<2x2x32xf32, #tpu.memory_space<vmem>>, vector<1x2x32xf32>
    %27 = vector.shape_cast %26 : vector<1x2x32xf32> to vector<2x32xf32>
    %c8 = arith.constant 8 : index
    %c0_30 = arith.constant 0 : index
    %28 = vector.load %arg16[%c8, %c0_30] : memref<16x32xf32, #tpu.memory_space<vmem>>, vector<8x32xf32>
    %c0_31 = arith.constant 0 : index
    %c0_32 = arith.constant 0 : index
    %29 = vector.load %arg3[%c0_31, %c0_32] : memref<32x128xf32, #tpu.memory_space<vmem>>, vector<32x128xf32>
    %cst_33 = arith.constant dense<0.000000e+00> : vector<8x128xf32>
    %30 = tpu.matmul %28, %29, %cst_33 {dimension_numbers = #tpu.dot_dimension_numbers<[1], [0], [0], [1], [0, 0, 1, 1], [], []>} : vector<8x32xf32>, vector<32x128xf32>, vector<8x128xf32> -> vector<8x128xf32>
    %c0_34 = arith.constant 0 : index
    %c0_35 = arith.constant 0 : index
    %31 = vector.load %arg5[%c0_34, %c0_35] : memref<1x128xf32, #tpu.memory_space<vmem>>, vector<1x128xf32>
    %32 = vector.broadcast %31 : vector<1x128xf32> to vector<8x128xf32>
    %33 = arith.addf %30, %32 : vector<8x128xf32>
    %c1_36 = arith.constant 1 : index
    %c0_37 = arith.constant 0 : index
    %c0_38 = arith.constant 0 : index
    %34 = vector.load %arg18[%c1_36, %c0_37, %c0_38] : memref<2x8x128xf32, #tpu.memory_space<vmem>>, vector<1x8x128xf32>
    %35 = vector.shape_cast %34 : vector<1x8x128xf32> to vector<8x128xf32>
    %36 = vector.shape_cast %33 : vector<8x128xf32> to vector<1x8x128xf32>
    tpu.vector_store %arg18[%c1_36, %c0_37, %c0_38], %36 {strides = array<i32>} : memref<2x8x128xf32, #tpu.memory_space<vmem>>, vector<1x8x128xf32>,
    %c0_i32_39 = arith.constant 0 : i32
    %c2_i32 = arith.constant 2 : i32
    %37 = arith.muli %c0_i32_39, %c2_i32 : i32
    %c0_40 = arith.constant 0 : index
    %38 = arith.index_cast %37 : i32 to index
    %c0_41 = arith.constant 0 : index
    %39 = vector.load %arg18[%c0_40, %38, %c0_41] : memref<2x8x128xf32, #tpu.memory_space<vmem>>, vector<1x2x128xf32>
    %40 = vector.shape_cast %39 : vector<1x2x128xf32> to vector<2x128xf32>
    %cst_42 = arith.constant dense<0.000000e+00> : vector<2x128xf32>
    %41 = tpu.matmul %25, %14, %cst_42 {dimension_numbers = #tpu.dot_dimension_numbers<[1], [0], [0], [1], [0, 0, 1, 1], [], []>} : vector<2x32xf32>, vector<32x128xf32>, vector<2x128xf32> -> vector<2x128xf32>
    %42 = arith.addf %40, %41 : vector<2x128xf32>
    %43 = arith.negf %42 : vector<2x128xf32>
    %44 = math.exp %43 : vector<2x128xf32>
    %cst_43 = arith.constant 1.000000e+00 : f32
    %45 = vector.broadcast %cst_43 : f32 to vector<2x128xf32>
    %46 = arith.addf %45, %44 : vector<2x128xf32>
    %47 = arith.divf %45, %46 : vector<2x128xf32>
    %48 = math.tanh %42 : vector<2x128xf32>
    %49 = arith.select %2, %47, %48 : vector<2x128xi1>, vector<2x128xf32>
    %50 = vector.extract_strided_slice %49 {offsets = [0, 0], sizes = [2, 32], strides = [1, 1]} : vector<2x128xf32> to vector<2x32xf32>
    %51 = vector.extract_strided_slice %49 {offsets = [0, 32], sizes = [2, 32], strides = [1, 1]} : vector<2x128xf32> to vector<2x32xf32>
    %52 = vector.extract_strided_slice %49 {offsets = [0, 64], sizes = [2, 32], strides = [1, 1]} : vector<2x128xf32> to vector<2x32xf32>
    %53 = vector.extract_strided_slice %49 {offsets = [0, 96], sizes = [2, 32], strides = [1, 1]} : vector<2x128xf32> to vector<2x32xf32>
    %54 = arith.mulf %51, %27 : vector<2x32xf32>
    %55 = arith.mulf %50, %53 : vector<2x32xf32>
    %56 = arith.addf %54, %55 : vector<2x32xf32>
    %57 = math.tanh %56 : vector<2x32xf32>
    %58 = arith.mulf %52, %57 : vector<2x32xf32>
    %c2_i32_44 = arith.constant 2 : i32
    %59 = arith.muli %c0_i32_39, %c2_i32_44 : i32
    %c0_i32_45 = arith.constant 0 : i32
    %60 = arith.addi %c0_i32_45, %59 : i32
    %61 = arith.index_cast %60 : i32 to index
    %c0_46 = arith.constant 0 : index
    %62 = vector.load %arg17[%61, %c0_46] : memref<16x32xf32, #tpu.memory_space<vmem>>, vector<2x32xf32>
    tpu.vector_store %arg17[%61, %c0_46], %58 {strides = array<i32>} : memref<16x32xf32, #tpu.memory_space<vmem>>, vector<2x32xf32>,
    %c1_i32_47 = arith.constant 1 : i32
    %c2_i32_48 = arith.constant 2 : i32
    %63 = arith.muli %c1_i32_47, %c2_i32_48 : i32
    %c0_49 = arith.constant 0 : index
    %64 = arith.index_cast %63 : i32 to index
    %c0_50 = arith.constant 0 : index
    %65 = vector.load %arg18[%c0_49, %64, %c0_50] : memref<2x8x128xf32, #tpu.memory_space<vmem>>, vector<1x2x128xf32>
    %66 = vector.shape_cast %65 : vector<1x2x128xf32> to vector<2x128xf32>
    %cst_51 = arith.constant dense<0.000000e+00> : vector<2x128xf32>
    %67 = tpu.matmul %58, %14, %cst_51 {dimension_numbers = #tpu.dot_dimension_numbers<[1], [0], [0], [1], [0, 0, 1, 1], [], []>} : vector<2x32xf32>, vector<32x128xf32>, vector<2x128xf32> -> vector<2x128xf32>
    %68 = arith.addf %66, %67 : vector<2x128xf32>
    %69 = arith.negf %68 : vector<2x128xf32>
    %70 = math.exp %69 : vector<2x128xf32>
    %cst_52 = arith.constant 1.000000e+00 : f32
    %71 = vector.broadcast %cst_52 : f32 to vector<2x128xf32>
    %72 = arith.addf %71, %70 : vector<2x128xf32>
    %73 = arith.divf %71, %72 : vector<2x128xf32>
    %74 = math.tanh %68 : vector<2x128xf32>
    %75 = arith.select %2, %73, %74 : vector<2x128xi1>, vector<2x128xf32>
    %76 = vector.extract_strided_slice %75 {offsets = [0, 0], sizes = [2, 32], strides = [1, 1]} : vector<2x128xf32> to vector<2x32xf32>
    %77 = vector.extract_strided_slice %75 {offsets = [0, 32], sizes = [2, 32], strides = [1, 1]} : vector<2x128xf32> to vector<2x32xf32>
    %78 = vector.extract_strided_slice %75 {offsets = [0, 64], sizes = [2, 32], strides = [1, 1]} : vector<2x128xf32> to vector<2x32xf32>
    %79 = vector.extract_strided_slice %75 {offsets = [0, 96], sizes = [2, 32], strides = [1, 1]} : vector<2x128xf32> to vector<2x32xf32>
    %80 = arith.mulf %77, %56 : vector<2x32xf32>
    %81 = arith.mulf %76, %79 : vector<2x32xf32>
    %82 = arith.addf %80, %81 : vector<2x32xf32>
    %83 = math.tanh %82 : vector<2x32xf32>
    %84 = arith.mulf %78, %83 : vector<2x32xf32>
    %c2_i32_53 = arith.constant 2 : i32
    %85 = arith.muli %c1_i32_47, %c2_i32_53 : i32
    %c0_i32_54 = arith.constant 0 : i32
    %86 = arith.addi %c0_i32_54, %85 : i32
    %87 = arith.index_cast %86 : i32 to index
    %c0_55 = arith.constant 0 : index
    %88 = vector.load %arg17[%87, %c0_55] : memref<16x32xf32, #tpu.memory_space<vmem>>, vector<2x32xf32>
    tpu.vector_store %arg17[%87, %c0_55], %84 {strides = array<i32>} : memref<16x32xf32, #tpu.memory_space<vmem>>, vector<2x32xf32>,
    %c2_i32_56 = arith.constant 2 : i32
    %c2_i32_57 = arith.constant 2 : i32
    %89 = arith.muli %c2_i32_56, %c2_i32_57 : i32
    %c0_58 = arith.constant 0 : index
    %90 = arith.index_cast %89 : i32 to index
    %c0_59 = arith.constant 0 : index
    %91 = vector.load %arg18[%c0_58, %90, %c0_59] : memref<2x8x128xf32, #tpu.memory_space<vmem>>, vector<1x2x128xf32>
    %92 = vector.shape_cast %91 : vector<1x2x128xf32> to vector<2x128xf32>
    %cst_60 = arith.constant dense<0.000000e+00> : vector<2x128xf32>
    %93 = tpu.matmul %84, %14, %cst_60 {dimension_numbers = #tpu.dot_dimension_numbers<[1], [0], [0], [1], [0, 0, 1, 1], [], []>} : vector<2x32xf32>, vector<32x128xf32>, vector<2x128xf32> -> vector<2x128xf32>
    %94 = arith.addf %92, %93 : vector<2x128xf32>
    %95 = arith.negf %94 : vector<2x128xf32>
    %96 = math.exp %95 : vector<2x128xf32>
    %cst_61 = arith.constant 1.000000e+00 : f32
    %97 = vector.broadcast %cst_61 : f32 to vector<2x128xf32>
    %98 = arith.addf %97, %96 : vector<2x128xf32>
    %99 = arith.divf %97, %98 : vector<2x128xf32>
    %100 = math.tanh %94 : vector<2x128xf32>
    %101 = arith.select %2, %99, %100 : vector<2x128xi1>, vector<2x128xf32>
    %102 = vector.extract_strided_slice %101 {offsets = [0, 0], sizes = [2, 32], strides = [1, 1]} : vector<2x128xf32> to vector<2x32xf32>
    %103 = vector.extract_strided_slice %101 {offsets = [0, 32], sizes = [2, 32], strides = [1, 1]} : vector<2x128xf32> to vector<2x32xf32>
    %104 = vector.extract_strided_slice %101 {offsets = [0, 64], sizes = [2, 32], strides = [1, 1]} : vector<2x128xf32> to vector<2x32xf32>
    %105 = vector.extract_strided_slice %101 {offsets = [0, 96], sizes = [2, 32], strides = [1, 1]} : vector<2x128xf32> to vector<2x32xf32>
    %106 = arith.mulf %103, %82 : vector<2x32xf32>
    %107 = arith.mulf %102, %105 : vector<2x32xf32>
    %108 = arith.addf %106, %107 : vector<2x32xf32>
    %109 = math.tanh %108 : vector<2x32xf32>
    %110 = arith.mulf %104, %109 : vector<2x32xf32>
    %c2_i32_62 = arith.constant 2 : i32
    %111 = arith.muli %c2_i32_56, %c2_i32_62 : i32
    %c0_i32_63 = arith.constant 0 : i32
    %112 = arith.addi %c0_i32_63, %111 : i32
    %113 = arith.index_cast %112 : i32 to index
    %c0_64 = arith.constant 0 : index
    %114 = vector.load %arg17[%113, %c0_64] : memref<16x32xf32, #tpu.memory_space<vmem>>, vector<2x32xf32>
    tpu.vector_store %arg17[%113, %c0_64], %110 {strides = array<i32>} : memref<16x32xf32, #tpu.memory_space<vmem>>, vector<2x32xf32>,
    %c3_i32 = arith.constant 3 : i32
    %c2_i32_65 = arith.constant 2 : i32
    %115 = arith.muli %c3_i32, %c2_i32_65 : i32
    %c0_66 = arith.constant 0 : index
    %116 = arith.index_cast %115 : i32 to index
    %c0_67 = arith.constant 0 : index
    %117 = vector.load %arg18[%c0_66, %116, %c0_67] : memref<2x8x128xf32, #tpu.memory_space<vmem>>, vector<1x2x128xf32>
    %118 = vector.shape_cast %117 : vector<1x2x128xf32> to vector<2x128xf32>
    %cst_68 = arith.constant dense<0.000000e+00> : vector<2x128xf32>
    %119 = tpu.matmul %110, %14, %cst_68 {dimension_numbers = #tpu.dot_dimension_numbers<[1], [0], [0], [1], [0, 0, 1, 1], [], []>} : vector<2x32xf32>, vector<32x128xf32>, vector<2x128xf32> -> vector<2x128xf32>
    %120 = arith.addf %118, %119 : vector<2x128xf32>
    %121 = arith.negf %120 : vector<2x128xf32>
    %122 = math.exp %121 : vector<2x128xf32>
    %cst_69 = arith.constant 1.000000e+00 : f32
    %123 = vector.broadcast %cst_69 : f32 to vector<2x128xf32>
    %124 = arith.addf %123, %122 : vector<2x128xf32>
    %125 = arith.divf %123, %124 : vector<2x128xf32>
    %126 = math.tanh %120 : vector<2x128xf32>
    %127 = arith.select %2, %125, %126 : vector<2x128xi1>, vector<2x128xf32>
    %128 = vector.extract_strided_slice %127 {offsets = [0, 0], sizes = [2, 32], strides = [1, 1]} : vector<2x128xf32> to vector<2x32xf32>
    %129 = vector.extract_strided_slice %127 {offsets = [0, 32], sizes = [2, 32], strides = [1, 1]} : vector<2x128xf32> to vector<2x32xf32>
    %130 = vector.extract_strided_slice %127 {offsets = [0, 64], sizes = [2, 32], strides = [1, 1]} : vector<2x128xf32> to vector<2x32xf32>
    %131 = vector.extract_strided_slice %127 {offsets = [0, 96], sizes = [2, 32], strides = [1, 1]} : vector<2x128xf32> to vector<2x32xf32>
    %132 = arith.mulf %129, %108 : vector<2x32xf32>
    %133 = arith.mulf %128, %131 : vector<2x32xf32>
    %134 = arith.addf %132, %133 : vector<2x32xf32>
    %135 = math.tanh %134 : vector<2x32xf32>
    %136 = arith.mulf %130, %135 : vector<2x32xf32>
    %c2_i32_70 = arith.constant 2 : i32
    %137 = arith.muli %c3_i32, %c2_i32_70 : i32
    %c0_i32_71 = arith.constant 0 : i32
    %138 = arith.addi %c0_i32_71, %137 : i32
    %139 = arith.index_cast %138 : i32 to index
    %c0_72 = arith.constant 0 : index
    %140 = vector.load %arg17[%139, %c0_72] : memref<16x32xf32, #tpu.memory_space<vmem>>, vector<2x32xf32>
    tpu.vector_store %arg17[%139, %c0_72], %136 {strides = array<i32>} : memref<16x32xf32, #tpu.memory_space<vmem>>, vector<2x32xf32>,
    %c4_i32 = arith.constant 4 : i32
    %c0_i32_73 = arith.constant 0 : i32
    %c2_i32_74 = arith.constant 2 : i32
    %141 = arith.muli %c0_i32_73, %c2_i32_74 : i32
    %c1_75 = arith.constant 1 : index
    %142 = arith.index_cast %141 : i32 to index
    %c0_76 = arith.constant 0 : index
    %143 = vector.load %arg18[%c1_75, %142, %c0_76] : memref<2x8x128xf32, #tpu.memory_space<vmem>>, vector<1x2x128xf32>
    %144 = vector.shape_cast %143 : vector<1x2x128xf32> to vector<2x128xf32>
    %cst_77 = arith.constant dense<0.000000e+00> : vector<2x128xf32>
    %145 = tpu.matmul %136, %14, %cst_77 {dimension_numbers = #tpu.dot_dimension_numbers<[1], [0], [0], [1], [0, 0, 1, 1], [], []>} : vector<2x32xf32>, vector<32x128xf32>, vector<2x128xf32> -> vector<2x128xf32>
    %146 = arith.addf %144, %145 : vector<2x128xf32>
    %147 = arith.negf %146 : vector<2x128xf32>
    %148 = math.exp %147 : vector<2x128xf32>
    %cst_78 = arith.constant 1.000000e+00 : f32
    %149 = vector.broadcast %cst_78 : f32 to vector<2x128xf32>
    %150 = arith.addf %149, %148 : vector<2x128xf32>
    %151 = arith.divf %149, %150 : vector<2x128xf32>
    %152 = math.tanh %146 : vector<2x128xf32>
    %153 = arith.select %2, %151, %152 : vector<2x128xi1>, vector<2x128xf32>
    %154 = vector.extract_strided_slice %153 {offsets = [0, 0], sizes = [2, 32], strides = [1, 1]} : vector<2x128xf32> to vector<2x32xf32>
    %155 = vector.extract_strided_slice %153 {offsets = [0, 32], sizes = [2, 32], strides = [1, 1]} : vector<2x128xf32> to vector<2x32xf32>
    %156 = vector.extract_strided_slice %153 {offsets = [0, 64], sizes = [2, 32], strides = [1, 1]} : vector<2x128xf32> to vector<2x32xf32>
    %157 = vector.extract_strided_slice %153 {offsets = [0, 96], sizes = [2, 32], strides = [1, 1]} : vector<2x128xf32> to vector<2x32xf32>
    %158 = arith.mulf %155, %134 : vector<2x32xf32>
    %159 = arith.mulf %154, %157 : vector<2x32xf32>
    %160 = arith.addf %158, %159 : vector<2x32xf32>
    %161 = math.tanh %160 : vector<2x32xf32>
    %162 = arith.mulf %156, %161 : vector<2x32xf32>
    %c2_i32_79 = arith.constant 2 : i32
    %163 = arith.muli %c0_i32_73, %c2_i32_79 : i32
    %c8_i32_80 = arith.constant 8 : i32
    %164 = arith.addi %c8_i32_80, %163 : i32
    %165 = arith.index_cast %164 : i32 to index
    %c0_81 = arith.constant 0 : index
    %166 = vector.load %arg17[%165, %c0_81] : memref<16x32xf32, #tpu.memory_space<vmem>>, vector<2x32xf32>
    tpu.vector_store %arg17[%165, %c0_81], %162 {strides = array<i32>} : memref<16x32xf32, #tpu.memory_space<vmem>>, vector<2x32xf32>,
    %c1_i32_82 = arith.constant 1 : i32
    %c2_i32_83 = arith.constant 2 : i32
    %167 = arith.muli %c1_i32_82, %c2_i32_83 : i32
    %c1_84 = arith.constant 1 : index
    %168 = arith.index_cast %167 : i32 to index
    %c0_85 = arith.constant 0 : index
    %169 = vector.load %arg18[%c1_84, %168, %c0_85] : memref<2x8x128xf32, #tpu.memory_space<vmem>>, vector<1x2x128xf32>
    %170 = vector.shape_cast %169 : vector<1x2x128xf32> to vector<2x128xf32>
    %cst_86 = arith.constant dense<0.000000e+00> : vector<2x128xf32>
    %171 = tpu.matmul %162, %14, %cst_86 {dimension_numbers = #tpu.dot_dimension_numbers<[1], [0], [0], [1], [0, 0, 1, 1], [], []>} : vector<2x32xf32>, vector<32x128xf32>, vector<2x128xf32> -> vector<2x128xf32>
    %172 = arith.addf %170, %171 : vector<2x128xf32>
    %173 = arith.negf %172 : vector<2x128xf32>
    %174 = math.exp %173 : vector<2x128xf32>
    %cst_87 = arith.constant 1.000000e+00 : f32
    %175 = vector.broadcast %cst_87 : f32 to vector<2x128xf32>
    %176 = arith.addf %175, %174 : vector<2x128xf32>
    %177 = arith.divf %175, %176 : vector<2x128xf32>
    %178 = math.tanh %172 : vector<2x128xf32>
    %179 = arith.select %2, %177, %178 : vector<2x128xi1>, vector<2x128xf32>
    %180 = vector.extract_strided_slice %179 {offsets = [0, 0], sizes = [2, 32], strides = [1, 1]} : vector<2x128xf32> to vector<2x32xf32>
    %181 = vector.extract_strided_slice %179 {offsets = [0, 32], sizes = [2, 32], strides = [1, 1]} : vector<2x128xf32> to vector<2x32xf32>
    %182 = vector.extract_strided_slice %179 {offsets = [0, 64], sizes = [2, 32], strides = [1, 1]} : vector<2x128xf32> to vector<2x32xf32>
    %183 = vector.extract_strided_slice %179 {offsets = [0, 96], sizes = [2, 32], strides = [1, 1]} : vector<2x128xf32> to vector<2x32xf32>
    %184 = arith.mulf %181, %160 : vector<2x32xf32>
    %185 = arith.mulf %180, %183 : vector<2x32xf32>
    %186 = arith.addf %184, %185 : vector<2x32xf32>
    %187 = math.tanh %186 : vector<2x32xf32>
    %188 = arith.mulf %182, %187 : vector<2x32xf32>
    %c2_i32_88 = arith.constant 2 : i32
    %189 = arith.muli %c1_i32_82, %c2_i32_88 : i32
    %c8_i32_89 = arith.constant 8 : i32
    %190 = arith.addi %c8_i32_89, %189 : i32
    %191 = arith.index_cast %190 : i32 to index
    %c0_90 = arith.constant 0 : index
    %192 = vector.load %arg17[%191, %c0_90] : memref<16x32xf32, #tpu.memory_space<vmem>>, vector<2x32xf32>
    tpu.vector_store %arg17[%191, %c0_90], %188 {strides = array<i32>} : memref<16x32xf32, #tpu.memory_space<vmem>>, vector<2x32xf32>,
    %c2_i32_91 = arith.constant 2 : i32
    %c2_i32_92 = arith.constant 2 : i32
    %193 = arith.muli %c2_i32_91, %c2_i32_92 : i32
    %c1_93 = arith.constant 1 : index
    %194 = arith.index_cast %193 : i32 to index
    %c0_94 = arith.constant 0 : index
    %195 = vector.load %arg18[%c1_93, %194, %c0_94] : memref<2x8x128xf32, #tpu.memory_space<vmem>>, vector<1x2x128xf32>
    %196 = vector.shape_cast %195 : vector<1x2x128xf32> to vector<2x128xf32>
    %cst_95 = arith.constant dense<0.000000e+00> : vector<2x128xf32>
    %197 = tpu.matmul %188, %14, %cst_95 {dimension_numbers = #tpu.dot_dimension_numbers<[1], [0], [0], [1], [0, 0, 1, 1], [], []>} : vector<2x32xf32>, vector<32x128xf32>, vector<2x128xf32> -> vector<2x128xf32>
    %198 = arith.addf %196, %197 : vector<2x128xf32>
    %199 = arith.negf %198 : vector<2x128xf32>
    %200 = math.exp %199 : vector<2x128xf32>
    %cst_96 = arith.constant 1.000000e+00 : f32
    %201 = vector.broadcast %cst_96 : f32 to vector<2x128xf32>
    %202 = arith.addf %201, %200 : vector<2x128xf32>
    %203 = arith.divf %201, %202 : vector<2x128xf32>
    %204 = math.tanh %198 : vector<2x128xf32>
    %205 = arith.select %2, %203, %204 : vector<2x128xi1>, vector<2x128xf32>
    %206 = vector.extract_strided_slice %205 {offsets = [0, 0], sizes = [2, 32], strides = [1, 1]} : vector<2x128xf32> to vector<2x32xf32>
    %207 = vector.extract_strided_slice %205 {offsets = [0, 32], sizes = [2, 32], strides = [1, 1]} : vector<2x128xf32> to vector<2x32xf32>
    %208 = vector.extract_strided_slice %205 {offsets = [0, 64], sizes = [2, 32], strides = [1, 1]} : vector<2x128xf32> to vector<2x32xf32>
    %209 = vector.extract_strided_slice %205 {offsets = [0, 96], sizes = [2, 32], strides = [1, 1]} : vector<2x128xf32> to vector<2x32xf32>
    %210 = arith.mulf %207, %186 : vector<2x32xf32>
    %211 = arith.mulf %206, %209 : vector<2x32xf32>
    %212 = arith.addf %210, %211 : vector<2x32xf32>
    %213 = math.tanh %212 : vector<2x32xf32>
    %214 = arith.mulf %208, %213 : vector<2x32xf32>
    %c2_i32_97 = arith.constant 2 : i32
    %215 = arith.muli %c2_i32_91, %c2_i32_97 : i32
    %c8_i32_98 = arith.constant 8 : i32
    %216 = arith.addi %c8_i32_98, %215 : i32
    %217 = arith.index_cast %216 : i32 to index
    %c0_99 = arith.constant 0 : index
    %218 = vector.load %arg17[%217, %c0_99] : memref<16x32xf32, #tpu.memory_space<vmem>>, vector<2x32xf32>
    tpu.vector_store %arg17[%217, %c0_99], %214 {strides = array<i32>} : memref<16x32xf32, #tpu.memory_space<vmem>>, vector<2x32xf32>,
    %c3_i32_100 = arith.constant 3 : i32
    %c2_i32_101 = arith.constant 2 : i32
    %219 = arith.muli %c3_i32_100, %c2_i32_101 : i32
    %c1_102 = arith.constant 1 : index
    %220 = arith.index_cast %219 : i32 to index
    %c0_103 = arith.constant 0 : index
    %221 = vector.load %arg18[%c1_102, %220, %c0_103] : memref<2x8x128xf32, #tpu.memory_space<vmem>>, vector<1x2x128xf32>
    %222 = vector.shape_cast %221 : vector<1x2x128xf32> to vector<2x128xf32>
    %cst_104 = arith.constant dense<0.000000e+00> : vector<2x128xf32>
    %223 = tpu.matmul %214, %14, %cst_104 {dimension_numbers = #tpu.dot_dimension_numbers<[1], [0], [0], [1], [0, 0, 1, 1], [], []>} : vector<2x32xf32>, vector<32x128xf32>, vector<2x128xf32> -> vector<2x128xf32>
    %224 = arith.addf %222, %223 : vector<2x128xf32>
    %225 = arith.negf %224 : vector<2x128xf32>
    %226 = math.exp %225 : vector<2x128xf32>
    %cst_105 = arith.constant 1.000000e+00 : f32
    %227 = vector.broadcast %cst_105 : f32 to vector<2x128xf32>
    %228 = arith.addf %227, %226 : vector<2x128xf32>
    %229 = arith.divf %227, %228 : vector<2x128xf32>
    %230 = math.tanh %224 : vector<2x128xf32>
    %231 = arith.select %2, %229, %230 : vector<2x128xi1>, vector<2x128xf32>
    %232 = vector.extract_strided_slice %231 {offsets = [0, 0], sizes = [2, 32], strides = [1, 1]} : vector<2x128xf32> to vector<2x32xf32>
    %233 = vector.extract_strided_slice %231 {offsets = [0, 32], sizes = [2, 32], strides = [1, 1]} : vector<2x128xf32> to vector<2x32xf32>
    %234 = vector.extract_strided_slice %231 {offsets = [0, 64], sizes = [2, 32], strides = [1, 1]} : vector<2x128xf32> to vector<2x32xf32>
    %235 = vector.extract_strided_slice %231 {offsets = [0, 96], sizes = [2, 32], strides = [1, 1]} : vector<2x128xf32> to vector<2x32xf32>
    %236 = arith.mulf %233, %212 : vector<2x32xf32>
    %237 = arith.mulf %232, %235 : vector<2x32xf32>
    %238 = arith.addf %236, %237 : vector<2x32xf32>
    %239 = math.tanh %238 : vector<2x32xf32>
    %240 = arith.mulf %234, %239 : vector<2x32xf32>
    %c2_i32_106 = arith.constant 2 : i32
    %241 = arith.muli %c3_i32_100, %c2_i32_106 : i32
    %c8_i32_107 = arith.constant 8 : i32
    %242 = arith.addi %c8_i32_107, %241 : i32
    %243 = arith.index_cast %242 : i32 to index
    %c0_108 = arith.constant 0 : index
    %244 = vector.load %arg17[%243, %c0_108] : memref<16x32xf32, #tpu.memory_space<vmem>>, vector<2x32xf32>
    tpu.vector_store %arg17[%243, %c0_108], %240 {strides = array<i32>} : memref<16x32xf32, #tpu.memory_space<vmem>>, vector<2x32xf32>,
    %c4_i32_109 = arith.constant 4 : i32
    %c0_110 = arith.constant 0 : index
    %c0_111 = arith.constant 0 : index
    %c0_112 = arith.constant 0 : index
    %245 = vector.load %arg14[%c0_110, %c0_111, %c0_112] : memref<2x2x32xf32, #tpu.memory_space<vmem>>, vector<1x2x32xf32>
    %246 = vector.shape_cast %245 : vector<1x2x32xf32> to vector<2x32xf32>
    %247 = vector.shape_cast %240 : vector<2x32xf32> to vector<1x2x32xf32>
    tpu.vector_store %arg14[%c0_110, %c0_111, %c0_112], %247 {strides = array<i32>} : memref<2x2x32xf32, #tpu.memory_space<vmem>>, vector<1x2x32xf32>,
    %c0_113 = arith.constant 0 : index
    %c0_114 = arith.constant 0 : index
    %c0_115 = arith.constant 0 : index
    %248 = vector.load %arg15[%c0_113, %c0_114, %c0_115] : memref<2x2x32xf32, #tpu.memory_space<vmem>>, vector<1x2x32xf32>
    %249 = vector.shape_cast %248 : vector<1x2x32xf32> to vector<2x32xf32>
    %250 = vector.shape_cast %238 : vector<2x32xf32> to vector<1x2x32xf32>
    tpu.vector_store %arg15[%c0_113, %c0_114, %c0_115], %250 {strides = array<i32>} : memref<2x2x32xf32, #tpu.memory_space<vmem>>, vector<1x2x32xf32>,
    %c0_116 = arith.constant 0 : index
    %c0_117 = arith.constant 0 : index
    %251 = vector.load %arg7[%c0_116, %c0_117] : memref<32x128xf32, #tpu.memory_space<vmem>>, vector<32x128xf32>
    %c0_118 = arith.constant 0 : index
    %c0_119 = arith.constant 0 : index
    %252 = vector.load %arg17[%c0_118, %c0_119] : memref<16x32xf32, #tpu.memory_space<vmem>>, vector<8x32xf32>
    %c0_120 = arith.constant 0 : index
    %c0_121 = arith.constant 0 : index
    %253 = vector.load %arg6[%c0_120, %c0_121] : memref<32x128xf32, #tpu.memory_space<vmem>>, vector<32x128xf32>
    %cst_122 = arith.constant dense<0.000000e+00> : vector<8x128xf32>
    %254 = tpu.matmul %252, %253, %cst_122 {dimension_numbers = #tpu.dot_dimension_numbers<[1], [0], [0], [1], [0, 0, 1, 1], [], []>} : vector<8x32xf32>, vector<32x128xf32>, vector<8x128xf32> -> vector<8x128xf32>
    %c0_123 = arith.constant 0 : index
    %c0_124 = arith.constant 0 : index
    %255 = vector.load %arg8[%c0_123, %c0_124] : memref<1x128xf32, #tpu.memory_space<vmem>>, vector<1x128xf32>
    %256 = vector.broadcast %255 : vector<1x128xf32> to vector<8x128xf32>
    %257 = arith.addf %254, %256 : vector<8x128xf32>
    %c0_125 = arith.constant 0 : index
    %c0_126 = arith.constant 0 : index
    %c0_127 = arith.constant 0 : index
    %258 = vector.load %arg18[%c0_125, %c0_126, %c0_127] : memref<2x8x128xf32, #tpu.memory_space<vmem>>, vector<1x8x128xf32>
    %259 = vector.shape_cast %258 : vector<1x8x128xf32> to vector<8x128xf32>
    %260 = vector.shape_cast %257 : vector<8x128xf32> to vector<1x8x128xf32>
    tpu.vector_store %arg18[%c0_125, %c0_126, %c0_127], %260 {strides = array<i32>} : memref<2x8x128xf32, #tpu.memory_space<vmem>>, vector<1x8x128xf32>,
    %c1_128 = arith.constant 1 : index
    %c0_129 = arith.constant 0 : index
    %c0_130 = arith.constant 0 : index
    %261 = vector.load %arg9[%c1_128, %c0_129, %c0_130] : memref<2x2x32xf32, #tpu.memory_space<vmem>>, vector<1x2x32xf32>
    %262 = vector.shape_cast %261 : vector<1x2x32xf32> to vector<2x32xf32>
    %c1_131 = arith.constant 1 : index
    %c0_132 = arith.constant 0 : index
    %c0_133 = arith.constant 0 : index
    %263 = vector.load %arg10[%c1_131, %c0_132, %c0_133] : memref<2x2x32xf32, #tpu.memory_space<vmem>>, vector<1x2x32xf32>
    %264 = vector.shape_cast %263 : vector<1x2x32xf32> to vector<2x32xf32>
    %c8_134 = arith.constant 8 : index
    %c0_135 = arith.constant 0 : index
    %265 = vector.load %arg17[%c8_134, %c0_135] : memref<16x32xf32, #tpu.memory_space<vmem>>, vector<8x32xf32>
    %c0_136 = arith.constant 0 : index
    %c0_137 = arith.constant 0 : index
    %266 = vector.load %arg6[%c0_136, %c0_137] : memref<32x128xf32, #tpu.memory_space<vmem>>, vector<32x128xf32>
    %cst_138 = arith.constant dense<0.000000e+00> : vector<8x128xf32>
    %267 = tpu.matmul %265, %266, %cst_138 {dimension_numbers = #tpu.dot_dimension_numbers<[1], [0], [0], [1], [0, 0, 1, 1], [], []>} : vector<8x32xf32>, vector<32x128xf32>, vector<8x128xf32> -> vector<8x128xf32>
    %c0_139 = arith.constant 0 : index
    %c0_140 = arith.constant 0 : index
    %268 = vector.load %arg8[%c0_139, %c0_140] : memref<1x128xf32, #tpu.memory_space<vmem>>, vector<1x128xf32>
    %269 = vector.broadcast %268 : vector<1x128xf32> to vector<8x128xf32>
    %270 = arith.addf %267, %269 : vector<8x128xf32>
    %c1_141 = arith.constant 1 : index
    %c0_142 = arith.constant 0 : index
    %c0_143 = arith.constant 0 : index
    %271 = vector.load %arg18[%c1_141, %c0_142, %c0_143] : memref<2x8x128xf32, #tpu.memory_space<vmem>>, vector<1x8x128xf32>
    %272 = vector.shape_cast %271 : vector<1x8x128xf32> to vector<8x128xf32>
    %273 = vector.shape_cast %270 : vector<8x128xf32> to vector<1x8x128xf32>
    tpu.vector_store %arg18[%c1_141, %c0_142, %c0_143], %273 {strides = array<i32>} : memref<2x8x128xf32, #tpu.memory_space<vmem>>, vector<1x8x128xf32>,
    %c0_i32_144 = arith.constant 0 : i32
    %c2_i32_145 = arith.constant 2 : i32
    %274 = arith.muli %c0_i32_144, %c2_i32_145 : i32
    %c0_146 = arith.constant 0 : index
    %275 = arith.index_cast %274 : i32 to index
    %c0_147 = arith.constant 0 : index
    %276 = vector.load %arg18[%c0_146, %275, %c0_147] : memref<2x8x128xf32, #tpu.memory_space<vmem>>, vector<1x2x128xf32>
    %277 = vector.shape_cast %276 : vector<1x2x128xf32> to vector<2x128xf32>
    %cst_148 = arith.constant dense<0.000000e+00> : vector<2x128xf32>
    %278 = tpu.matmul %262, %251, %cst_148 {dimension_numbers = #tpu.dot_dimension_numbers<[1], [0], [0], [1], [0, 0, 1, 1], [], []>} : vector<2x32xf32>, vector<32x128xf32>, vector<2x128xf32> -> vector<2x128xf32>
    %279 = arith.addf %277, %278 : vector<2x128xf32>
    %280 = arith.negf %279 : vector<2x128xf32>
    %281 = math.exp %280 : vector<2x128xf32>
    %cst_149 = arith.constant 1.000000e+00 : f32
    %282 = vector.broadcast %cst_149 : f32 to vector<2x128xf32>
    %283 = arith.addf %282, %281 : vector<2x128xf32>
    %284 = arith.divf %282, %283 : vector<2x128xf32>
    %285 = math.tanh %279 : vector<2x128xf32>
    %286 = arith.select %2, %284, %285 : vector<2x128xi1>, vector<2x128xf32>
    %287 = vector.extract_strided_slice %286 {offsets = [0, 0], sizes = [2, 32], strides = [1, 1]} : vector<2x128xf32> to vector<2x32xf32>
    %288 = vector.extract_strided_slice %286 {offsets = [0, 32], sizes = [2, 32], strides = [1, 1]} : vector<2x128xf32> to vector<2x32xf32>
    %289 = vector.extract_strided_slice %286 {offsets = [0, 64], sizes = [2, 32], strides = [1, 1]} : vector<2x128xf32> to vector<2x32xf32>
    %290 = vector.extract_strided_slice %286 {offsets = [0, 96], sizes = [2, 32], strides = [1, 1]} : vector<2x128xf32> to vector<2x32xf32>
    %291 = arith.mulf %288, %264 : vector<2x32xf32>
    %292 = arith.mulf %287, %290 : vector<2x32xf32>
    %293 = arith.addf %291, %292 : vector<2x32xf32>
    %294 = math.tanh %293 : vector<2x32xf32>
    %295 = arith.mulf %289, %294 : vector<2x32xf32>
    %c1_i32_150 = arith.constant 1 : i32
    %c2_i32_151 = arith.constant 2 : i32
    %296 = arith.muli %c1_i32_150, %c2_i32_151 : i32
    %c0_152 = arith.constant 0 : index
    %297 = arith.index_cast %296 : i32 to index
    %c0_153 = arith.constant 0 : index
    %298 = vector.load %arg18[%c0_152, %297, %c0_153] : memref<2x8x128xf32, #tpu.memory_space<vmem>>, vector<1x2x128xf32>
    %299 = vector.shape_cast %298 : vector<1x2x128xf32> to vector<2x128xf32>
    %cst_154 = arith.constant dense<0.000000e+00> : vector<2x128xf32>
    %300 = tpu.matmul %295, %251, %cst_154 {dimension_numbers = #tpu.dot_dimension_numbers<[1], [0], [0], [1], [0, 0, 1, 1], [], []>} : vector<2x32xf32>, vector<32x128xf32>, vector<2x128xf32> -> vector<2x128xf32>
    %301 = arith.addf %299, %300 : vector<2x128xf32>
    %302 = arith.negf %301 : vector<2x128xf32>
    %303 = math.exp %302 : vector<2x128xf32>
    %cst_155 = arith.constant 1.000000e+00 : f32
    %304 = vector.broadcast %cst_155 : f32 to vector<2x128xf32>
    %305 = arith.addf %304, %303 : vector<2x128xf32>
    %306 = arith.divf %304, %305 : vector<2x128xf32>
    %307 = math.tanh %301 : vector<2x128xf32>
    %308 = arith.select %2, %306, %307 : vector<2x128xi1>, vector<2x128xf32>
    %309 = vector.extract_strided_slice %308 {offsets = [0, 0], sizes = [2, 32], strides = [1, 1]} : vector<2x128xf32> to vector<2x32xf32>
    %310 = vector.extract_strided_slice %308 {offsets = [0, 32], sizes = [2, 32], strides = [1, 1]} : vector<2x128xf32> to vector<2x32xf32>
    %311 = vector.extract_strided_slice %308 {offsets = [0, 64], sizes = [2, 32], strides = [1, 1]} : vector<2x128xf32> to vector<2x32xf32>
    %312 = vector.extract_strided_slice %308 {offsets = [0, 96], sizes = [2, 32], strides = [1, 1]} : vector<2x128xf32> to vector<2x32xf32>
    %313 = arith.mulf %310, %293 : vector<2x32xf32>
    %314 = arith.mulf %309, %312 : vector<2x32xf32>
    %315 = arith.addf %313, %314 : vector<2x32xf32>
    %316 = math.tanh %315 : vector<2x32xf32>
    %317 = arith.mulf %311, %316 : vector<2x32xf32>
    %c2_i32_156 = arith.constant 2 : i32
    %c2_i32_157 = arith.constant 2 : i32
    %318 = arith.muli %c2_i32_156, %c2_i32_157 : i32
    %c0_158 = arith.constant 0 : index
    %319 = arith.index_cast %318 : i32 to index
    %c0_159 = arith.constant 0 : index
    %320 = vector.load %arg18[%c0_158, %319, %c0_159] : memref<2x8x128xf32, #tpu.memory_space<vmem>>, vector<1x2x128xf32>
    %321 = vector.shape_cast %320 : vector<1x2x128xf32> to vector<2x128xf32>
    %cst_160 = arith.constant dense<0.000000e+00> : vector<2x128xf32>
    %322 = tpu.matmul %317, %251, %cst_160 {dimension_numbers = #tpu.dot_dimension_numbers<[1], [0], [0], [1], [0, 0, 1, 1], [], []>} : vector<2x32xf32>, vector<32x128xf32>, vector<2x128xf32> -> vector<2x128xf32>
    %323 = arith.addf %321, %322 : vector<2x128xf32>
    %324 = arith.negf %323 : vector<2x128xf32>
    %325 = math.exp %324 : vector<2x128xf32>
    %cst_161 = arith.constant 1.000000e+00 : f32
    %326 = vector.broadcast %cst_161 : f32 to vector<2x128xf32>
    %327 = arith.addf %326, %325 : vector<2x128xf32>
    %328 = arith.divf %326, %327 : vector<2x128xf32>
    %329 = math.tanh %323 : vector<2x128xf32>
    %330 = arith.select %2, %328, %329 : vector<2x128xi1>, vector<2x128xf32>
    %331 = vector.extract_strided_slice %330 {offsets = [0, 0], sizes = [2, 32], strides = [1, 1]} : vector<2x128xf32> to vector<2x32xf32>
    %332 = vector.extract_strided_slice %330 {offsets = [0, 32], sizes = [2, 32], strides = [1, 1]} : vector<2x128xf32> to vector<2x32xf32>
    %333 = vector.extract_strided_slice %330 {offsets = [0, 64], sizes = [2, 32], strides = [1, 1]} : vector<2x128xf32> to vector<2x32xf32>
    %334 = vector.extract_strided_slice %330 {offsets = [0, 96], sizes = [2, 32], strides = [1, 1]} : vector<2x128xf32> to vector<2x32xf32>
    %335 = arith.mulf %332, %315 : vector<2x32xf32>
    %336 = arith.mulf %331, %334 : vector<2x32xf32>
    %337 = arith.addf %335, %336 : vector<2x32xf32>
    %338 = math.tanh %337 : vector<2x32xf32>
    %339 = arith.mulf %333, %338 : vector<2x32xf32>
    %c3_i32_162 = arith.constant 3 : i32
    %c2_i32_163 = arith.constant 2 : i32
    %340 = arith.muli %c3_i32_162, %c2_i32_163 : i32
    %c0_164 = arith.constant 0 : index
    %341 = arith.index_cast %340 : i32 to index
    %c0_165 = arith.constant 0 : index
    %342 = vector.load %arg18[%c0_164, %341, %c0_165] : memref<2x8x128xf32, #tpu.memory_space<vmem>>, vector<1x2x128xf32>
    %343 = vector.shape_cast %342 : vector<1x2x128xf32> to vector<2x128xf32>
    %cst_166 = arith.constant dense<0.000000e+00> : vector<2x128xf32>
    %344 = tpu.matmul %339, %251, %cst_166 {dimension_numbers = #tpu.dot_dimension_numbers<[1], [0], [0], [1], [0, 0, 1, 1], [], []>} : vector<2x32xf32>, vector<32x128xf32>, vector<2x128xf32> -> vector<2x128xf32>
    %345 = arith.addf %343, %344 : vector<2x128xf32>
    %346 = arith.negf %345 : vector<2x128xf32>
    %347 = math.exp %346 : vector<2x128xf32>
    %cst_167 = arith.constant 1.000000e+00 : f32
    %348 = vector.broadcast %cst_167 : f32 to vector<2x128xf32>
    %349 = arith.addf %348, %347 : vector<2x128xf32>
    %350 = arith.divf %348, %349 : vector<2x128xf32>
    %351 = math.tanh %345 : vector<2x128xf32>
    %352 = arith.select %2, %350, %351 : vector<2x128xi1>, vector<2x128xf32>
    %353 = vector.extract_strided_slice %352 {offsets = [0, 0], sizes = [2, 32], strides = [1, 1]} : vector<2x128xf32> to vector<2x32xf32>
    %354 = vector.extract_strided_slice %352 {offsets = [0, 32], sizes = [2, 32], strides = [1, 1]} : vector<2x128xf32> to vector<2x32xf32>
    %355 = vector.extract_strided_slice %352 {offsets = [0, 64], sizes = [2, 32], strides = [1, 1]} : vector<2x128xf32> to vector<2x32xf32>
    %356 = vector.extract_strided_slice %352 {offsets = [0, 96], sizes = [2, 32], strides = [1, 1]} : vector<2x128xf32> to vector<2x32xf32>
    %357 = arith.mulf %354, %337 : vector<2x32xf32>
    %358 = arith.mulf %353, %356 : vector<2x32xf32>
    %359 = arith.addf %357, %358 : vector<2x32xf32>
    %360 = math.tanh %359 : vector<2x32xf32>
    %361 = arith.mulf %355, %360 : vector<2x32xf32>
    %c4_i32_168 = arith.constant 4 : i32
    %c0_i32_169 = arith.constant 0 : i32
    %c2_i32_170 = arith.constant 2 : i32
    %362 = arith.muli %c0_i32_169, %c2_i32_170 : i32
    %c1_171 = arith.constant 1 : index
    %363 = arith.index_cast %362 : i32 to index
    %c0_172 = arith.constant 0 : index
    %364 = vector.load %arg18[%c1_171, %363, %c0_172] : memref<2x8x128xf32, #tpu.memory_space<vmem>>, vector<1x2x128xf32>
    %365 = vector.shape_cast %364 : vector<1x2x128xf32> to vector<2x128xf32>
    %cst_173 = arith.constant dense<0.000000e+00> : vector<2x128xf32>
    %366 = tpu.matmul %361, %251, %cst_173 {dimension_numbers = #tpu.dot_dimension_numbers<[1], [0], [0], [1], [0, 0, 1, 1], [], []>} : vector<2x32xf32>, vector<32x128xf32>, vector<2x128xf32> -> vector<2x128xf32>
    %367 = arith.addf %365, %366 : vector<2x128xf32>
    %368 = arith.negf %367 : vector<2x128xf32>
    %369 = math.exp %368 : vector<2x128xf32>
    %cst_174 = arith.constant 1.000000e+00 : f32
    %370 = vector.broadcast %cst_174 : f32 to vector<2x128xf32>
    %371 = arith.addf %370, %369 : vector<2x128xf32>
    %372 = arith.divf %370, %371 : vector<2x128xf32>
    %373 = math.tanh %367 : vector<2x128xf32>
    %374 = arith.select %2, %372, %373 : vector<2x128xi1>, vector<2x128xf32>
    %375 = vector.extract_strided_slice %374 {offsets = [0, 0], sizes = [2, 32], strides = [1, 1]} : vector<2x128xf32> to vector<2x32xf32>
    %376 = vector.extract_strided_slice %374 {offsets = [0, 32], sizes = [2, 32], strides = [1, 1]} : vector<2x128xf32> to vector<2x32xf32>
    %377 = vector.extract_strided_slice %374 {offsets = [0, 64], sizes = [2, 32], strides = [1, 1]} : vector<2x128xf32> to vector<2x32xf32>
    %378 = vector.extract_strided_slice %374 {offsets = [0, 96], sizes = [2, 32], strides = [1, 1]} : vector<2x128xf32> to vector<2x32xf32>
    %379 = arith.mulf %376, %359 : vector<2x32xf32>
    %380 = arith.mulf %375, %378 : vector<2x32xf32>
    %381 = arith.addf %379, %380 : vector<2x32xf32>
    %382 = math.tanh %381 : vector<2x32xf32>
    %383 = arith.mulf %377, %382 : vector<2x32xf32>
    %c1_i32_175 = arith.constant 1 : i32
    %c2_i32_176 = arith.constant 2 : i32
    %384 = arith.muli %c1_i32_175, %c2_i32_176 : i32
    %c1_177 = arith.constant 1 : index
    %385 = arith.index_cast %384 : i32 to index
    %c0_178 = arith.constant 0 : index
    %386 = vector.load %arg18[%c1_177, %385, %c0_178] : memref<2x8x128xf32, #tpu.memory_space<vmem>>, vector<1x2x128xf32>
    %387 = vector.shape_cast %386 : vector<1x2x128xf32> to vector<2x128xf32>
    %cst_179 = arith.constant dense<0.000000e+00> : vector<2x128xf32>
    %388 = tpu.matmul %383, %251, %cst_179 {dimension_numbers = #tpu.dot_dimension_numbers<[1], [0], [0], [1], [0, 0, 1, 1], [], []>} : vector<2x32xf32>, vector<32x128xf32>, vector<2x128xf32> -> vector<2x128xf32>
    %389 = arith.addf %387, %388 : vector<2x128xf32>
    %390 = arith.negf %389 : vector<2x128xf32>
    %391 = math.exp %390 : vector<2x128xf32>
    %cst_180 = arith.constant 1.000000e+00 : f32
    %392 = vector.broadcast %cst_180 : f32 to vector<2x128xf32>
    %393 = arith.addf %392, %391 : vector<2x128xf32>
    %394 = arith.divf %392, %393 : vector<2x128xf32>
    %395 = math.tanh %389 : vector<2x128xf32>
    %396 = arith.select %2, %394, %395 : vector<2x128xi1>, vector<2x128xf32>
    %397 = vector.extract_strided_slice %396 {offsets = [0, 0], sizes = [2, 32], strides = [1, 1]} : vector<2x128xf32> to vector<2x32xf32>
    %398 = vector.extract_strided_slice %396 {offsets = [0, 32], sizes = [2, 32], strides = [1, 1]} : vector<2x128xf32> to vector<2x32xf32>
    %399 = vector.extract_strided_slice %396 {offsets = [0, 64], sizes = [2, 32], strides = [1, 1]} : vector<2x128xf32> to vector<2x32xf32>
    %400 = vector.extract_strided_slice %396 {offsets = [0, 96], sizes = [2, 32], strides = [1, 1]} : vector<2x128xf32> to vector<2x32xf32>
    %401 = arith.mulf %398, %381 : vector<2x32xf32>
    %402 = arith.mulf %397, %400 : vector<2x32xf32>
    %403 = arith.addf %401, %402 : vector<2x32xf32>
    %404 = math.tanh %403 : vector<2x32xf32>
    %405 = arith.mulf %399, %404 : vector<2x32xf32>
    %c2_i32_181 = arith.constant 2 : i32
    %c2_i32_182 = arith.constant 2 : i32
    %406 = arith.muli %c2_i32_181, %c2_i32_182 : i32
    %c1_183 = arith.constant 1 : index
    %407 = arith.index_cast %406 : i32 to index
    %c0_184 = arith.constant 0 : index
    %408 = vector.load %arg18[%c1_183, %407, %c0_184] : memref<2x8x128xf32, #tpu.memory_space<vmem>>, vector<1x2x128xf32>
    %409 = vector.shape_cast %408 : vector<1x2x128xf32> to vector<2x128xf32>
    %cst_185 = arith.constant dense<0.000000e+00> : vector<2x128xf32>
    %410 = tpu.matmul %405, %251, %cst_185 {dimension_numbers = #tpu.dot_dimension_numbers<[1], [0], [0], [1], [0, 0, 1, 1], [], []>} : vector<2x32xf32>, vector<32x128xf32>, vector<2x128xf32> -> vector<2x128xf32>
    %411 = arith.addf %409, %410 : vector<2x128xf32>
    %412 = arith.negf %411 : vector<2x128xf32>
    %413 = math.exp %412 : vector<2x128xf32>
    %cst_186 = arith.constant 1.000000e+00 : f32
    %414 = vector.broadcast %cst_186 : f32 to vector<2x128xf32>
    %415 = arith.addf %414, %413 : vector<2x128xf32>
    %416 = arith.divf %414, %415 : vector<2x128xf32>
    %417 = math.tanh %411 : vector<2x128xf32>
    %418 = arith.select %2, %416, %417 : vector<2x128xi1>, vector<2x128xf32>
    %419 = vector.extract_strided_slice %418 {offsets = [0, 0], sizes = [2, 32], strides = [1, 1]} : vector<2x128xf32> to vector<2x32xf32>
    %420 = vector.extract_strided_slice %418 {offsets = [0, 32], sizes = [2, 32], strides = [1, 1]} : vector<2x128xf32> to vector<2x32xf32>
    %421 = vector.extract_strided_slice %418 {offsets = [0, 64], sizes = [2, 32], strides = [1, 1]} : vector<2x128xf32> to vector<2x32xf32>
    %422 = vector.extract_strided_slice %418 {offsets = [0, 96], sizes = [2, 32], strides = [1, 1]} : vector<2x128xf32> to vector<2x32xf32>
    %423 = arith.mulf %420, %403 : vector<2x32xf32>
    %424 = arith.mulf %419, %422 : vector<2x32xf32>
    %425 = arith.addf %423, %424 : vector<2x32xf32>
    %426 = math.tanh %425 : vector<2x32xf32>
    %427 = arith.mulf %421, %426 : vector<2x32xf32>
    %c3_i32_187 = arith.constant 3 : i32
    %c2_i32_188 = arith.constant 2 : i32
    %428 = arith.muli %c3_i32_187, %c2_i32_188 : i32
    %c1_189 = arith.constant 1 : index
    %429 = arith.index_cast %428 : i32 to index
    %c0_190 = arith.constant 0 : index
    %430 = vector.load %arg18[%c1_189, %429, %c0_190] : memref<2x8x128xf32, #tpu.memory_space<vmem>>, vector<1x2x128xf32>
    %431 = vector.shape_cast %430 : vector<1x2x128xf32> to vector<2x128xf32>
    %cst_191 = arith.constant dense<0.000000e+00> : vector<2x128xf32>
    %432 = tpu.matmul %427, %251, %cst_191 {dimension_numbers = #tpu.dot_dimension_numbers<[1], [0], [0], [1], [0, 0, 1, 1], [], []>} : vector<2x32xf32>, vector<32x128xf32>, vector<2x128xf32> -> vector<2x128xf32>
    %433 = arith.addf %431, %432 : vector<2x128xf32>
    %434 = arith.negf %433 : vector<2x128xf32>
    %435 = math.exp %434 : vector<2x128xf32>
    %cst_192 = arith.constant 1.000000e+00 : f32
    %436 = vector.broadcast %cst_192 : f32 to vector<2x128xf32>
    %437 = arith.addf %436, %435 : vector<2x128xf32>
    %438 = arith.divf %436, %437 : vector<2x128xf32>
    %439 = math.tanh %433 : vector<2x128xf32>
    %440 = arith.select %2, %438, %439 : vector<2x128xi1>, vector<2x128xf32>
    %441 = vector.extract_strided_slice %440 {offsets = [0, 0], sizes = [2, 32], strides = [1, 1]} : vector<2x128xf32> to vector<2x32xf32>
    %442 = vector.extract_strided_slice %440 {offsets = [0, 32], sizes = [2, 32], strides = [1, 1]} : vector<2x128xf32> to vector<2x32xf32>
    %443 = vector.extract_strided_slice %440 {offsets = [0, 64], sizes = [2, 32], strides = [1, 1]} : vector<2x128xf32> to vector<2x32xf32>
    %444 = vector.extract_strided_slice %440 {offsets = [0, 96], sizes = [2, 32], strides = [1, 1]} : vector<2x128xf32> to vector<2x32xf32>
    %445 = arith.mulf %442, %425 : vector<2x32xf32>
    %446 = arith.mulf %441, %444 : vector<2x32xf32>
    %447 = arith.addf %445, %446 : vector<2x32xf32>
    %448 = math.tanh %447 : vector<2x32xf32>
    %449 = arith.mulf %443, %448 : vector<2x32xf32>
    %c4_i32_193 = arith.constant 4 : i32
    %c1_194 = arith.constant 1 : index
    %c0_195 = arith.constant 0 : index
    %c0_196 = arith.constant 0 : index
    %450 = vector.load %arg14[%c1_194, %c0_195, %c0_196] : memref<2x2x32xf32, #tpu.memory_space<vmem>>, vector<1x2x32xf32>
    %451 = vector.shape_cast %450 : vector<1x2x32xf32> to vector<2x32xf32>
    %452 = vector.shape_cast %449 : vector<2x32xf32> to vector<1x2x32xf32>
    tpu.vector_store %arg14[%c1_194, %c0_195, %c0_196], %452 {strides = array<i32>} : memref<2x2x32xf32, #tpu.memory_space<vmem>>, vector<1x2x32xf32>,
    %c1_197 = arith.constant 1 : index
    %c0_198 = arith.constant 0 : index
    %c0_199 = arith.constant 0 : index
    %453 = vector.load %arg15[%c1_197, %c0_198, %c0_199] : memref<2x2x32xf32, #tpu.memory_space<vmem>>, vector<1x2x32xf32>
    %454 = vector.shape_cast %453 : vector<1x2x32xf32> to vector<2x32xf32>
    %455 = vector.shape_cast %447 : vector<2x32xf32> to vector<1x2x32xf32>
    tpu.vector_store %arg15[%c1_197, %c0_198, %c0_199], %455 {strides = array<i32>} : memref<2x2x32xf32, #tpu.memory_space<vmem>>, vector<1x2x32xf32>,
    %c0_200 = arith.constant 0 : index
    %c0_201 = arith.constant 0 : index
    %456 = vector.load %arg11[%c0_200, %c0_201] : memref<32x1xf32, #tpu.memory_space<vmem>>, vector<32x1xf32>
    %cst_202 = arith.constant dense<0.000000e+00> : vector<2x1xf32>
    %457 = tpu.matmul %449, %456, %cst_202 {dimension_numbers = #tpu.dot_dimension_numbers<[1], [0], [0], [1], [0, 0, 1, 1], [], []>} : vector<2x32xf32>, vector<32x1xf32>, vector<2x1xf32> -> vector<2x1xf32>
    %c0_203 = arith.constant 0 : index
    %c0_204 = arith.constant 0 : index
    %458 = vector.load %arg12[%c0_203, %c0_204] : memref<1x1xf32, #tpu.memory_space<vmem>>, vector<1x1xf32>
    %459 = vector.broadcast %458 : vector<1x1xf32> to vector<2x1xf32>
    %460 = arith.addf %457, %459 : vector<2x1xf32>
    %c0_205 = arith.constant 0 : index
    %c0_206 = arith.constant 0 : index
    %461 = vector.load %arg13[%c0_205, %c0_206] : memref<2x1xf32, #tpu.memory_space<vmem>>, vector<2x1xf32>
    tpu.vector_store %arg13[%c0_205, %c0_206], %460 {strides = array<i32>} : memref<2x1xf32, #tpu.memory_space<vmem>>, vector<2x1xf32>,
    return
  }
  func.func @transform_1(%arg0: i32, %arg1: memref<2x8xi32, #tpu.memory_space<smem>>) -> (i32, i32) {
    %c0_i32 = arith.constant 0 : i32
    %c0_i32_0 = arith.constant 0 : i32
    %c0_i32_1 = arith.constant 0 : i32
    return %c0_i32, %c0_i32_0 : i32, i32
  }
  func.func @transform_2(%arg0: i32, %arg1: memref<2x8xi32, #tpu.memory_space<smem>>) -> (i32, i32) {
    %c0_i32 = arith.constant 0 : i32
    %c0_i32_0 = arith.constant 0 : i32
    %c0_i32_1 = arith.constant 0 : i32
    return %c0_i32, %c0_i32_0 : i32, i32
  }
  func.func @transform_3(%arg0: i32, %arg1: memref<2x8xi32, #tpu.memory_space<smem>>) -> (i32, i32) {
    %c0_i32 = arith.constant 0 : i32
    %c0_i32_0 = arith.constant 0 : i32
    %c0_i32_1 = arith.constant 0 : i32
    return %c0_i32, %c0_i32_0 : i32, i32
  }
  func.func @transform_4(%arg0: i32, %arg1: memref<2x8xi32, #tpu.memory_space<smem>>) -> (i32, i32) {
    %c0_i32 = arith.constant 0 : i32
    %c0_i32_0 = arith.constant 0 : i32
    %c0_i32_1 = arith.constant 0 : i32
    return %c0_i32, %c0_i32_0 : i32, i32
  }
  func.func @transform_5(%arg0: i32, %arg1: memref<2x8xi32, #tpu.memory_space<smem>>) -> (i32, i32) {
    %c0_i32 = arith.constant 0 : i32
    %c0_i32_0 = arith.constant 0 : i32
    %c0_i32_1 = arith.constant 0 : i32
    return %c0_i32, %c0_i32_0 : i32, i32
  }
  func.func @transform_6(%arg0: i32, %arg1: memref<2x8xi32, #tpu.memory_space<smem>>) -> (i32, i32) {
    %c0_i32 = arith.constant 0 : i32
    %c0_i32_0 = arith.constant 0 : i32
    %c0_i32_1 = arith.constant 0 : i32
    return %c0_i32, %c0_i32_0 : i32, i32
  }
  func.func @transform_7(%arg0: i32, %arg1: memref<2x8xi32, #tpu.memory_space<smem>>) -> (i32, i32, i32) {
    %c0_i32 = arith.constant 0 : i32
    %c0_i32_0 = arith.constant 0 : i32
    %c0_i32_1 = arith.constant 0 : i32
    %c0_i32_2 = arith.constant 0 : i32
    return %c0_i32, %c0_i32_0, %c0_i32_1 : i32, i32, i32
  }
  func.func @transform_8(%arg0: i32, %arg1: memref<2x8xi32, #tpu.memory_space<smem>>) -> (i32, i32, i32) {
    %c0_i32 = arith.constant 0 : i32
    %c0_i32_0 = arith.constant 0 : i32
    %c0_i32_1 = arith.constant 0 : i32
    %c0_i32_2 = arith.constant 0 : i32
    return %c0_i32, %c0_i32_0, %c0_i32_1 : i32, i32, i32
  }
  func.func @transform_9(%arg0: i32, %arg1: memref<2x8xi32, #tpu.memory_space<smem>>) -> (i32, i32) {
    %c0_i32 = arith.constant 0 : i32
    %c0_i32_0 = arith.constant 0 : i32
    %c0_i32_1 = arith.constant 0 : i32
    return %c0_i32, %c0_i32_0 : i32, i32
  }
  func.func @transform_10(%arg0: i32, %arg1: memref<2x8xi32, #tpu.memory_space<smem>>) -> (i32, i32) {
    %c0_i32 = arith.constant 0 : i32
    %c0_i32_0 = arith.constant 0 : i32
    %c0_i32_1 = arith.constant 0 : i32
    return %c0_i32, %c0_i32_0 : i32, i32
  }
  func.func @transform_11(%arg0: i32, %arg1: memref<2x8xi32, #tpu.memory_space<smem>>) -> (i32, i32) {
    %c0_i32 = arith.constant 0 : i32
    %c0_i32_0 = arith.constant 0 : i32
    %c0_i32_1 = arith.constant 0 : i32
    return %c0_i32, %c0_i32_0 : i32, i32
  }
  func.func @transform_12(%arg0: i32, %arg1: memref<2x8xi32, #tpu.memory_space<smem>>) -> (i32, i32, i32) {
    %c0_i32 = arith.constant 0 : i32
    %c0_i32_0 = arith.constant 0 : i32
    %c0_i32_1 = arith.constant 0 : i32
    %c0_i32_2 = arith.constant 0 : i32
    return %c0_i32, %c0_i32_0, %c0_i32_1 : i32, i32, i32
  }
  func.func @transform_13(%arg0: i32, %arg1: memref<2x8xi32, #tpu.memory_space<smem>>) -> (i32, i32, i32) {
    %c0_i32 = arith.constant 0 : i32
    %c0_i32_0 = arith.constant 0 : i32
    %c0_i32_1 = arith.constant 0 : i32
    %c0_i32_2 = arith.constant 0 : i32
    return %c0_i32, %c0_i32_0, %c0_i32_1 : i32, i32, i32
  }
}

</mosaic_0001>

<bundles_post_ra>
// kernel: tpu_custom_call.1
= control target key start
LH: loop header
LB: loop body
LE: loop exit
PB: predicated region body
PF: predicated region fallthrough
CT: control target
= control target key end

     0   :  { %s3796_s0 = inlined_call_operand.hbm [shape: s32[2,8], index: 0, kind: input, shape index: {}]   ;;  %s3797_s1 = inlined_call_operand.vmem [shape: f32[50,32], index: 1, kind: input, shape index: {}]   ;;  %s3798_s2 = inlined_call_operand.vmem [shape: f32[32,128], index: 2, kind: input, shape index: {}]   ;;  %s3799_s3 = inlined_call_operand.vmem [shape: f32[32,128], index: 3, kind: input, shape index: {}]   ;;  %s3800_s4 = inlined_call_operand.vmem [shape: f32[1,128], index: 4, kind: input, shape index: {}]   ;;  %s3801_s5 = inlined_call_operand.vmem [shape: f32[32,128], index: 5, kind: input, shape index: {}]   ;;  %s3802_s6 = inlined_call_operand.vmem [shape: f32[32,128], index: 6, kind: input, shape index: {}]   ;;  %s3803_s7 = inlined_call_operand.vmem [shape: f32[1,128], index: 7, kind: input, shape index: {}]   ;;  %s3804_s8 = inlined_call_operand.vmem [shape: f32[2,2,32], index: 8, kind: input, shape index: {}]   ;;  %s3805_s9 = inlined_call_operand.vmem [shape: f32[2,2,32], index: 9, kind: input, shape index: {}]   ;;  %s3806_s10 = inlined_call_operand.vmem [shape: f32[32,1], index: 10, kind: input, shape index: {}]   ;;  %s3807_s12 = inlined_call_operand.vmem [shape: f32[2,1], index: 12, kind: output, shape index: {0}]   ;;  %s3808_s13 = inlined_call_operand.hbm [shape: f32[2,2,32], index: 13, kind: output, shape index: {1}]   ;;  %s3809_s14 = inlined_call_operand.hbm [shape: f32[2,2,32], index: 14, kind: output, shape index: {2}]   ;;  %s3810_s11 = inlined_call_operand.<no memory space> [shape: f32[1,1], index: 11, kind: input, shape index: {}]  }
   0x1   :  { %3812 = sst [smem:[#allocation22_spill]] %s3807_s12  ;;  %s3209_s15 = scalar_lea.hbm %s3796_s0, 32 }
   0x2   :  { %3813 = sst [smem:[#allocation23_spill]] %s3809_s14  ;;  %p3210_p0 = scmp.ne.s32.totalorder %s3796_s0, %s3209_s15 }
   0x3   :  { %p3213_p1 = scmp.lt.u32.totalorder %s3209_s15, %s3796_s0 }
   0x5   :  { %p3215_p2 = pnand %p3213_p1, %p3210_p0 }
   0x7   :  { %3218 = shalt.err (!%p3215_p2)  }
   0x8   :  { %s3281_s20 = smov [#allocation7]   ;;  %v22_v0 = vstv %s3810_s11 }
   0x9   :  { %21 = dma.hbm_to_smem %s3796_s0, 32, %s3281_s20, [#allocation6]  ;;  %23 = vst [vmem:[#allocation8] sm:$0x1] %v22_v0 }
   0xa   :  { %3267 = dma.done.wait [#allocation6], 32 }
   0xb   :  { %3268 = vsyncadd [#allocation6], 4294967264 }
   0xc   :  { %25 = sfence }
   0xd   :  { %26 = vsyncpa [#allocation10], 0 }
   0xe   :  { %27 = vsyncpa [#allocation12], 0  ;;  %v48_v1 = vlaneseq  ;;  %s51_s25 = sld [smem:[#allocation7]] }
  0x10   :  { %v3381_v2 = vand.u32 127, %v48_v1 }
  0x12   :  { %vm50_vm0 = vcmp.lt.s32.totalorder %v3381_v2, 96 }
  0x14   :  { %s52_s0 = scalar_lea.vmem %s3797_s1, %s51_s25 }
  0x15   :  { %v70_v3 = vld [vmem:[%s52_s0] sm:$0x1] }
  0x16   :  { %71 = vst [vmem:[#allocation2] sm:$0x1] %v70_v3 }
  0x17   :  { %96 = vsyncadd [#allocation5], 16  ;;  %s2535_s11 = sld [smem:[#allocation7 + $0x80]] }
  0x1d   :  { %s98_s30 = scalar_lea.vmem %s3797_s1, %s2535_s11 }
  0x1e   :  { %v118_v4 = vld [vmem:[%s98_s30] sm:$0x1] }
  0x1f   :  { %119 = vst [vmem:[#allocation2 + $0x1] sm:$0x1] %v118_v4 }
  0x20   :  { %144 = vsyncadd [#allocation5 + $0x1], 16  ;;  %s3390_s15 = smov 0  }
  0x21 LB: > { %p151_p3 = scmp.lt.s32.totalorder %s3279_s15, 0  ;;  %s152_s16 = ssub.s32 0, %s3279_s15  ;;  %s3279_s15 = sphi %s3390_s15, %s3814_s15  }
  0x22   : > { %s2536_s17 = smin.u32 %s3279_s15, %s152_s16  ;;  %s3393_s18 = sadd.s32 1, %s3279_s15  }
  0x23   : > { %s154_s19 = sand.u32 1, %s2536_s17   ;;  %p2539_p5 = scmp.ge.s32.totalorder %s3393_s18, 8 }
  0x24   : > { %s155_s20 = ssub.s32 0, %s154_s19  ;;  %s169_s23 = sld [smem:[#allocation7 + %s3393_s18]] (!%p2539_p5) }
  0x25   : > { %s3818_s20 = smov (!%p151_p3, %s155_s20), %s154_s19  ;;  %167 = sbr.rel (%p2539_p5) target bundleno = 59 (0x3b), region = 112 }
  0x26   : > { %p2538_p4 = scmp.lt.s32.totalorder %s3818_s20, 0  ;;  %s161_s21 = sadd.s32 2, %s3818_s20 }
  0x27   : > { %s2540_s25 = sshll.u32 (!%p2539_p5), %s3279_s15, 1 }
  0x28   : > { %s3820_s21 = smov (!%p2538_p4, %s161_s21), %s3818_s20  ;;  %s2476_s11 = scalar_lea.vmem (!%p2539_p5), [#allocation2], %s2540_s25 }
  0x29   : > { %s168_s22 = ssub.s32 (!%p2539_p5), 1, %s3820_s21 }
  0x2a   : > { %s2541_s24 = sshll.u32 (!%p2539_p5), %s168_s22, 1  ;;  %s171_s0 = scalar_lea.vmem (!%p2539_p5), %s3797_s1, %s169_s23 }
  0x2b   : > { %v192_v5 = vld [vmem:[%s171_s0] sm:$0x1] (!%p2539_p5)  ;;  %s174_s28 = scalar_lea.sflag (!%p2539_p5), [#allocation5], %s2541_s24 }
  0x2c   : > { %2543 = vst [vmem:[%s2476_s11 + $0x2] sm:$0x1] %v192_v5 }
  0x2d   : > { %218 = vsyncadd %s174_s28, 16  ;;  %s219_s29 = sshra.s32 %s3393_s18, 7  ;;  %s224_s30 = sand.u32 127, %s3393_s18 }
  0x2e   : > { %s2599_s16 = sshll.u32 %s219_s29, 7  ;;  %s2489_s17 = scalar_lea.sflag %s174_s28, 1 [#allocation5] }
  0x2f   : > { %s2600_s19 = sadd.s32 128, %s2599_s16 }
  0x30   : > { %s225_s20 = sadd.s32 %s2600_s19, %s224_s30 }
  0x31   : > { %s226_s12 = sld [smem:[#allocation7 + %s225_s20]] }
  0x37   : > { %s228_s14 = scalar_lea.vmem %s3797_s1, %s226_s12 }
  0x38   : > { %v249_v6 = vld [vmem:[%s228_s14] sm:$0x1] }
  0x39   : > { %2548 = vst [vmem:[%s2476_s11 + $0x3] sm:$0x1] %v249_v6 }
  0x3a   : > { %275 = vsyncadd %s2489_s17, 16 }
  0x3b PF: > { %s2549_s23 = sshll.u32 %s3820_s21, 1 }
  0x3c   : > { %s277_s24 = scalar_lea.sflag [#allocation5], %s2549_s23 }
  0x3d   : > { %3269 = dma.done.wait %s277_s24, 16 }
  0x3e   : > { %3270 = vsyncadd %s277_s24, 4294967280  ;;  %s2497_s25 = scalar_lea.sflag %s277_s24, 1 [#allocation5] }
  0x3f   : > { %3271 = dma.done.wait %s2497_s25, 16 }
  0x40   : > { %3272 = vsyncadd %s2497_s25, 4294967280  ;;  %s3814_s15 = smov %s3393_s18  ;;  %149 = sbr.rel (!%p2539_p5) target bundleno = 33 (0x21), region = 267  ;;  %v290_v7 = vld [vmem:[%s3798_s2] sm:$0xff] (%p2539_p5)  ;;  %v291_v8 = vld [vmem:[%s3798_s2 + $0x8] sm:$0xff] (%p2539_p5)  ;;  %v3282_v10 = vmov (%p2539_p5), 0.0|0.0   ;;  %vm3283_vm1 = vmmov (%p2539_p5), 0  }
  0x41   :  { %v292_v9 = vld [vmem:[%s3798_s2 + $0x10] sm:$0xff] (%p2539_p5)  ;;  %2937 = vmatprep.subr.bf16.mxu0 (%p2539_p5), %v3282_v10  ;;  %v2938_v11 = vpack.c.bf16 (%p2539_p5), %v291_v8, %v290_v7  ;;  %v293_v12 = vld [vmem:[%s3798_s2 + $0x18] sm:$0xff] (%p2539_p5)  ;;  %v3284_v13 = vmov (%p2539_p5), 0.0   ;;  %2943 = vmatprep.subr.bf16.mxu1 (%p2539_p5), %v3282_v10  ;;  %v285_v15 = vld [vmem:[%s3799_s3] sm:$0xff] (%p2539_p5)  ;;  %vm301_vm2 = vcmask (%p2539_p5), 261120   ;;  %s3286_s25 = smov (%p2539_p5), 64  }
  0x42   :  { %2714 = vmatprep.mubr.msk.f32.mxu0 (%p2539_p5), %vm3283_vm1, %v3284_v13  ;;  %2725 = vmatprep.mubr.msk.f32.mxu1 (%p2539_p5), %vm3283_vm1, %v3284_v13  ;;  %v2941_v14 = vpack.c.bf16 (%p2539_p5), %v293_v12, %v292_v9  ;;  %v286_v16 = vld [vmem:[%s3799_s3 + $0x8] sm:$0xff] (%p2539_p5)  ;;  %v289_v17 = vld [vmem:[#allocation2] sm:$0xff] (%p2539_p5)  ;;  %v287_v19 = vld [vmem:[%s3799_s3 + $0x10] sm:$0xff] (%p2539_p5)  ;;  %vm573_vm3 = vcmask (%p2539_p5), 254976   ;;  %s3287_s14 = smov (%p2539_p5), 96   ;;  %s3289_s0 = smov (%p2539_p5), [#allocation11]  }
  0x43   :  { %2939 = vmatpush3.bf16.msra.mxu0 (%p2539_p5), %v2938_v11  ;;  %2945 = vmatpush3.bf16.msra.mxu1 (%p2539_p5), %v2938_v11  ;;  %v3438_v18 = vpack.c.bf16 (%p2539_p5), %v286_v16, %v285_v15  ;;  %v288_v20 = vld [vmem:[%s3799_s3 + $0x18] sm:$0xff] (%p2539_p5)  ;;  %v376_v22 = vld [vmem:[%s3804_s8] sm:$0x3] (%p2539_p5)  ;;  %v378_v44 = vld [vmem:[#allocation2 + $0x8] sm:$0xff] (%p2539_p5)  ;;  %s2423_s11 = sshll.u32 (%p2539_p5), %s3289_s0, 4  ;;  %s2424_s11 = int_to_ptr.vmem [resolvable:$true] %s2423_s11 }
  0x44   :  { %2940 = vmatprep.subr.bf16.mxu0 (%p2539_p5), %v3282_v10  ;;  %2946 = vmatprep.subr.bf16.mxu1 (%p2539_p5), %v3282_v10  ;;  %v3450_v21 = vpack.c.bf16 (%p2539_p5), %v288_v20, %v287_v19  ;;  %v2551_v23 = vld [vmem:[%s3800_s4] ss:$0 sm:$0xff] (%p2539_p5)  ;;  %s3285_s4 = smov (%p2539_p5), 32   ;;  %v2321_v2 = vld [vmem:[%s3806_s10 + $0x10] sm:$0xff] (%p2539_p5) }
  0x45   :  { %v377_v37 = vld [vmem:[%s3805_s9] sm:$0x3] (%p2539_p5) }
  0x47   :  { %2942 = vmatpush3.bf16.msra.mxu0 %v2941_v14  ;;  %2948 = vmatpush3.bf16.msra.mxu1 %v2941_v14 }
  0x48   :  { %2949 = vmatprep.subr.bf16.mxu0 %v3282_v10  ;;  %2955 = vmatprep.subr.bf16.mxu1 %v3282_v10 }
  0x4a   :  { %2715 = vmatmul.mubr.msk.f32.vlgmr.msra.gmra.mrb[0].mxu0 %vm301_vm2, %v289_v17  ;;  %2726 = vmatmul.mubr.msk.f32.vlgmr.msra.gmra.mrb[0].mxu1 %vm301_vm2, %v378_v44 }
  0x4b   :  { %2951 = vmatpush3.bf16.msra.mxu0 %v3438_v18  ;;  %2736 = vmatprep.mubr.msk.f32.mxu0 %vm3283_vm1, %v3284_v13 }
  0x4c   :  { %2952 = vmatprep.subr.bf16.mxu0 %v3282_v10  ;;  %2957 = vmatpush3.bf16.msra.mxu1 %v3438_v18 }
  0x4d   :  { %2747 = vmatprep.mubr.msk.f32.mxu1 %vm3283_vm1, %v3284_v13  ;;  %2958 = vmatprep.subr.bf16.mxu1 %v3282_v10 }
  0x4f   :  { %2954 = vmatpush3.bf16.msra.mxu0 %v3450_v21 }
  0x50   :  { %2961 = vmatprep.subr.bf16.mxu0 %v3282_v10  ;;  %2960 = vmatpush3.bf16.msra.mxu1 %v3450_v21 }
  0x51   :  { %2967 = vmatprep.subr.bf16.mxu1 %v3282_v10 }
  0x52   :  { %2737 = vmatmul.mubr.msk.f32.vlgmr.msra.gmra.mrb[2].mxu0 %vm301_vm2, %v376_v22 }
  0x53   :  { %2963 = vmatpush3.bf16.msra.mxu0 %v3438_v18  ;;  %2758 = vmatprep.mubr.msk.f32.mxu0 %vm3283_vm1, %v3284_v13 }
  0x54   :  { %2964 = vmatprep.subr.bf16.mxu0 %v3282_v10 }
  0x57   :  { %2966 = vmatpush3.bf16.msra.mxu0 %v3450_v21 }
  0x58   :  { %2973 = vmatprep.subr.bf16.mxu0 %v3282_v10 }
 0x11d   :  { %v371_v24 = vpop.f32.mrb[0].mxu0  ;;  %v459_v48 = vpop.f32.mrb[0].mxu1 }
 0x11e   :  { %v372_v25 = vadd.f32 %v2551_v23, %v371_v24  ;;  %v2716_v26 = vpop.f32.mrb[1].mxu0  ;;  %v460_v49 = vadd.f32 %v2551_v23, %v459_v48  ;;  %v2727_v50 = vpop.f32.mrb[1].mxu1 }
 0x120   :  { %375 = vst [vmem:[#allocation4] sm:$0xff] %v372_v25  ;;  %464 = vst [vmem:[#allocation4 + $0x8] sm:$0xff] %v460_v49 }
 0x125   :  { %v535_v27 = vpop.f32.mrb[2].mxu0 }
 0x126   :  { %v2738_v28 = vpop.f32.mrb[3].mxu0 }
 0x127   :  { %v465_v29 = vld [vmem:[#allocation4] sm:$0x3]  ;;  %v575_v52 = vld [vmem:[#allocation4 + $0x2] sm:$0x3]  ;;  %v679_v8 = vld [vmem:[#allocation4 + $0x4] sm:$0x3] }
 0x128   :  { %v539_v30 = vadd.f32 %v535_v27, %v465_v29  ;;  %v887_v50 = vld [vmem:[#allocation4 + $0x8] sm:$0x3] }
 0x12a   :  { %v2556_v31 = vmul.f32 -1.442695, %v539_v30 }
 0x12c   :  { %3081 = vpow2.f32 %v2556_v31  ;;  %v783_v31 = vld [vmem:[#allocation4 + $0x6] sm:$0x3] }
 0x12d   :  { %3083 = vtanh.f32 %v539_v30 }
 0x136   :  { %v3082_v32 = vpop.eup %3081 }
 0x137   :  { %v543_v33 = vadd.f32 1.0, %v3082_v32  ;;  %v3084_v34 = vpop.eup %3083 }
 0x139   :  { %3085 = vrcp.f32 %v543_v33 }
 0x143   :  { %v3086_v35 = vpop.eup %3085 }
 0x144   :  { %v547_v36 = vsel %vm50_vm0, %v3086_v35, %v3084_v34 }
 0x145   :  { %554 = vrot.lane.b32.xlu0 %v547_v36, %s3285_s4 }
 0x149   :  { %549 = vrot.lane.b32.xlu0 %v377_v37, %s3285_s4 }
 0x1b7   :  { %v555_v38 = vpop.permute.xlu0 %554 }
 0x1b8   :  { %v557_v39 = vmul.f32 %v555_v38, %v547_v36 }
 0x1ba   :  { %559 = vrot.lane.b32.xlu1 %v557_v39, %s3285_s4 }
 0x1bb   :  { %v550_v40 = vpop.permute.xlu0 %549 }
 0x1bc   :  { %v552_v41 = vmul.f32 %v550_v40, %v547_v36 }
 0x22c   :  { %v560_v42 = vpop.permute.xlu1 %559 }
 0x22d   :  { %v562_v43 = vadd.f32 %v560_v42, %v552_v41 }
 0x22f   :  { %3087 = vtanh.f32 %v562_v43 }
 0x239   :  { %v3088_v45 = vpop.eup %3087 }
 0x23a   :  { %565 = vrot.lane.b32.xlu1 %v3088_v45, %s3285_s4 }
 0x2ac   :  { %v566_v46 = vpop.permute.xlu1 %565 }
 0x2ad   :  { %v568_v47 = vmul.f32 %v566_v46, %v547_v36 }
 0x2af   :  { %570 = vrot.lane.b32.xlu0 %v568_v47, %s3286_s25 }
 0x321   :  { %v571_v51 = vpop.permute.xlu0 %570 }
 0x322   :  { %574 = vst.msk [vmem:[#allocation3] sm:$0x3] %vm573_vm3, %v571_v51  ;;  %2748 = vmatmul.mubr.msk.f32.vlgmr.msra.gmra.mrb[2].mxu1 %vm301_vm2, %v571_v51 }
 0x323   :  { %2969 = vmatpush3.bf16.msra.mxu1 %v3438_v18  ;;  %2769 = vmatprep.mubr.msk.f32.mxu1 %vm3283_vm1, %v3284_v13 }
 0x324   :  { %2970 = vmatprep.subr.bf16.mxu1 %v3282_v10 }
 0x327   :  { %2972 = vmatpush3.bf16.msra.mxu1 %v3450_v21 }
 0x328   :  { %2979 = vmatprep.subr.bf16.mxu1 %v3282_v10 }
 0x3f5   :  { %v644_v53 = vpop.f32.mrb[2].mxu1 }
 0x3f6   :  { %v648_v54 = vadd.f32 %v644_v53, %v575_v52  ;;  %v2749_v55 = vpop.f32.mrb[3].mxu1 }
 0x3f8   :  { %v2558_v56 = vmul.f32 -1.442695, %v648_v54 }
 0x3fa   :  { %3089 = vpow2.f32 %v2558_v56 }
 0x3fb   :  { %3091 = vtanh.f32 %v648_v54 }
 0x404   :  { %v3090_v57 = vpop.eup %3089 }
 0x405   :  { %v652_v58 = vadd.f32 1.0, %v3090_v57  ;;  %v3092_v59 = vpop.eup %3091 }
 0x407   :  { %3093 = vrcp.f32 %v652_v58 }
 0x411   :  { %v3094_v60 = vpop.eup %3093 }
 0x412   :  { %v656_v61 = vsel %vm50_vm0, %v3094_v60, %v3092_v59 }
 0x413   :  { %659 = vrot.lane.b32.xlu1 %v656_v61, %s3285_s4  ;;  %v657_v0 = vmul.f32 %v656_v61, %v562_v43 }
 0x485   :  { %v660_v62 = vpop.permute.xlu1 %659 }
 0x486   :  { %v662_v63 = vmul.f32 %v660_v62, %v656_v61 }
 0x488   :  { %664 = vrot.lane.b32.xlu0 %v662_v63, %s3285_s4 }
 0x4fa   :  { %v665_v1 = vpop.permute.xlu0 %664 }
 0x4fb   :  { %v667_v3 = vadd.f32 %v665_v1, %v657_v0 }
 0x4fd   :  { %3095 = vtanh.f32 %v667_v3 }
 0x507   :  { %v3096_v4 = vpop.eup %3095 }
 0x508   :  { %670 = vrot.lane.b32.xlu1 %v3096_v4, %s3285_s4 }
 0x57a   :  { %v671_v5 = vpop.permute.xlu1 %670 }
 0x57b   :  { %v673_v6 = vmul.f32 %v671_v5, %v656_v61 }
 0x57d   :  { %675 = vrot.lane.b32.xlu0 %v673_v6, %s3286_s25  ;;  %v991_v6 = vld [vmem:[#allocation4 + $0xa] sm:$0x3] }
 0x5ef   :  { %v676_v7 = vpop.permute.xlu0 %675 }
 0x5f0   :  { %678 = vst.msk [vmem:[#allocation3 + $0x2] sm:$0x3] %vm573_vm3, %v676_v7  ;;  %2759 = vmatmul.mubr.msk.f32.vlgmr.msra.gmra.mrb[4].mxu0 %vm301_vm2, %v676_v7 }
 0x5f1   :  { %2975 = vmatpush3.bf16.msra.mxu0 %v3438_v18  ;;  %2780 = vmatprep.mubr.msk.f32.mxu0 %vm3283_vm1, %v3284_v13 }
 0x5f2   :  { %2976 = vmatprep.subr.bf16.mxu0 %v3282_v10 }
 0x5f5   :  { %2978 = vmatpush3.bf16.msra.mxu0 %v3450_v21 }
 0x5f6   :  { %2985 = vmatprep.subr.bf16.mxu0 %v3282_v10 }
 0x6c3   :  { %v748_v9 = vpop.f32.mrb[4].mxu0 }
 0x6c4   :  { %v752_v11 = vadd.f32 %v748_v9, %v679_v8  ;;  %v2760_v12 = vpop.f32.mrb[5].mxu0 }
 0x6c6   :  { %v2560_v14 = vmul.f32 -1.442695, %v752_v11 }
 0x6c8   :  { %3097 = vpow2.f32 %v2560_v14 }
 0x6c9   :  { %3099 = vtanh.f32 %v752_v11 }
 0x6d2   :  { %v3098_v15 = vpop.eup %3097 }
 0x6d3   :  { %v756_v16 = vadd.f32 1.0, %v3098_v15  ;;  %v3100_v17 = vpop.eup %3099 }
 0x6d5   :  { %3101 = vrcp.f32 %v756_v16 }
 0x6df   :  { %v3102_v19 = vpop.eup %3101 }
 0x6e0   :  { %v760_v20 = vsel %vm50_vm0, %v3102_v19, %v3100_v17 }
 0x6e1   :  { %763 = vrot.lane.b32.xlu1 %v760_v20, %s3285_s4  ;;  %v761_v24 = vmul.f32 %v760_v20, %v667_v3 }
 0x753   :  { %v764_v22 = vpop.permute.xlu1 %763 }
 0x754   :  { %v766_v23 = vmul.f32 %v764_v22, %v760_v20 }
 0x756   :  { %768 = vrot.lane.b32.xlu0 %v766_v23, %s3285_s4 }
 0x7c8   :  { %v769_v25 = vpop.permute.xlu0 %768 }
 0x7c9   :  { %v771_v26 = vadd.f32 %v769_v25, %v761_v24 }
 0x7cb   :  { %3103 = vtanh.f32 %v771_v26 }
 0x7d5   :  { %v3104_v27 = vpop.eup %3103 }
 0x7d6   :  { %774 = vrot.lane.b32.xlu1 %v3104_v27, %s3285_s4  ;;  %v1315_v27 = vld [vmem:[%s3801_s5 + $0x8] sm:$0xff] }
 0x848   :  { %v775_v28 = vpop.permute.xlu1 %774 }
 0x849   :  { %v777_v29 = vmul.f32 %v775_v28, %v760_v20 }
 0x84b   :  { %779 = vrot.lane.b32.xlu0 %v777_v29, %s3286_s25  ;;  %v1316_v29 = vld [vmem:[%s3801_s5 + $0x10] sm:$0xff] }
 0x8bd   :  { %v780_v30 = vpop.permute.xlu0 %779 }
 0x8be   :  { %782 = vst.msk [vmem:[#allocation3 + $0x4] sm:$0x3] %vm573_vm3, %v780_v30  ;;  %2770 = vmatmul.mubr.msk.f32.vlgmr.msra.gmra.mrb[4].mxu1 %vm301_vm2, %v780_v30  ;;  %v1317_v30 = vld [vmem:[%s3801_s5 + $0x18] sm:$0xff] }
 0x8bf   :  { %2981 = vmatpush3.bf16.msra.mxu1 %v3438_v18  ;;  %2791 = vmatprep.mubr.msk.f32.mxu1 %vm3283_vm1, %v3284_v13 }
 0x8c0   :  { %2982 = vmatprep.subr.bf16.mxu1 %v3282_v10 }
 0x8c3   :  { %2984 = vmatpush3.bf16.msra.mxu1 %v3450_v21 }
 0x8c4   :  { %2991 = vmatprep.subr.bf16.mxu1 %v3282_v10 }
 0x991   :  { %v852_v32 = vpop.f32.mrb[4].mxu1 }
 0x992   :  { %v856_v33 = vadd.f32 %v852_v32, %v783_v31  ;;  %v2771_v34 = vpop.f32.mrb[5].mxu1  ;;  %v3577_v32 = vpack.c.bf16 %v1317_v30, %v1316_v29 }
 0x993   :  { %v1310_v34 = vld [vmem:[%s3802_s6 + $0x8] sm:$0xff] }
 0x994   :  { %v2562_v35 = vmul.f32 -1.442695, %v856_v33 }
 0x996   :  { %3105 = vpow2.f32 %v2562_v35 }
 0x997   :  { %3107 = vtanh.f32 %v856_v33  ;;  %v1309_v33 = vld [vmem:[%s3802_s6] sm:$0xff] }
 0x998   :  { %v3589_v35 = vpack.c.bf16 %v1310_v34, %v1309_v33 }
 0x9a0   :  { %v3106_v36 = vpop.eup %3105 }
 0x9a1   :  { %v860_v37 = vadd.f32 1.0, %v3106_v36  ;;  %v3108_v38 = vpop.eup %3107  ;;  %v1311_v36 = vld [vmem:[%s3802_s6 + $0x10] sm:$0xff] }
 0x9a3   :  { %3109 = vrcp.f32 %v860_v37  ;;  %v1312_v37 = vld [vmem:[%s3802_s6 + $0x18] sm:$0xff] }
 0x9ad   :  { %v3110_v39 = vpop.eup %3109 }
 0x9ae   :  { %v864_v40 = vsel %vm50_vm0, %v3110_v39, %v3108_v38  ;;  %v3600_v39 = vpack.c.bf16 %v1312_v37, %v1311_v36 }
 0x9af   :  { %867 = vrot.lane.b32.xlu1 %v864_v40, %s3285_s4  ;;  %v865_v43 = vmul.f32 %v864_v40, %v771_v26  ;;  %v1314_v26 = vld [vmem:[%s3801_s5] sm:$0xff] }
 0x9b0   :  { %v3566_v28 = vpack.c.bf16 %v1315_v27, %v1314_v26 }
 0xa21   :  { %v868_v41 = vpop.permute.xlu1 %867 }
 0xa22   :  { %v870_v42 = vmul.f32 %v868_v41, %v864_v40  ;;  %v1095_v41 = vld [vmem:[#allocation4 + $0xc] sm:$0x3] }
 0xa24   :  { %872 = vrot.lane.b32.xlu0 %v870_v42, %s3285_s4 }
 0xa96   :  { %v873_v44 = vpop.permute.xlu0 %872 }
 0xa97   :  { %v875_v45 = vadd.f32 %v873_v44, %v865_v43 }
 0xa99   :  { %3111 = vtanh.f32 %v875_v45 }
 0xaa3   :  { %v3112_v46 = vpop.eup %3111 }
 0xaa4   :  { %878 = vrot.lane.b32.xlu1 %v3112_v46, %s3285_s4  ;;  %v3620_v46 = vld [vmem:[%s3803_s7] ss:$0 sm:$0xff] }
 0xb16   :  { %v879_v47 = vpop.permute.xlu1 %878 }
 0xb17   :  { %v881_v48 = vmul.f32 %v879_v47, %v864_v40  ;;  %v2573_v40 = vld [vmem:[%s3804_s8 + $0x2] sm:$0x3] }
 0xb19   :  { %883 = vrot.lane.b32.xlu0 %v881_v48, %s3286_s25 }
 0xb8b   :  { %v884_v49 = vpop.permute.xlu0 %883 }
 0xb8c   :  { %886 = vst.msk [vmem:[#allocation3 + $0x6] sm:$0x3] %vm573_vm3, %v884_v49  ;;  %2781 = vmatmul.mubr.msk.f32.vlgmr.msra.gmra.mrb[6].mxu0 %vm301_vm2, %v884_v49 }
 0xb8d   :  { %2987 = vmatpush3.bf16.msra.mxu0 %v3438_v18  ;;  %2802 = vmatprep.mubr.msk.f32.mxu0 %vm3283_vm1, %v3284_v13 }
 0xb8e   :  { %2988 = vmatprep.subr.bf16.mxu0 %v3282_v10 }
 0xb91   :  { %2990 = vmatpush3.bf16.msra.mxu0 %v3450_v21 }
 0xb92   :  { %2997 = vmatprep.subr.bf16.mxu0 %v3282_v10 }
 0xb93   :  { %v1313_v38 = vld [vmem:[#allocation3] sm:$0xff] }
 0xc5f   :  { %v956_v51 = vpop.f32.mrb[6].mxu0 }
 0xc60   :  { %v960_v52 = vadd.f32 %v956_v51, %v887_v50  ;;  %v2782_v53 = vpop.f32.mrb[7].mxu0 }
 0xc62   :  { %v2564_v54 = vmul.f32 -1.442695, %v960_v52 }
 0xc64   :  { %3113 = vpow2.f32 %v2564_v54 }
 0xc65   :  { %3115 = vtanh.f32 %v960_v52 }
 0xc6e   :  { %v3114_v55 = vpop.eup %3113 }
 0xc6f   :  { %v964_v56 = vadd.f32 1.0, %v3114_v55  ;;  %v3116_v57 = vpop.eup %3115 }
 0xc71   :  { %3117 = vrcp.f32 %v964_v56 }
 0xc7b   :  { %v3118_v58 = vpop.eup %3117 }
 0xc7c   :  { %v968_v59 = vsel %vm50_vm0, %v3118_v58, %v3116_v57 }
 0xc7d   :  { %971 = vrot.lane.b32.xlu1 %v968_v59, %s3285_s4  ;;  %v969_v62 = vmul.f32 %v968_v59, %v875_v45 }
 0xcef   :  { %v972_v60 = vpop.permute.xlu1 %971 }
 0xcf0   :  { %v974_v61 = vmul.f32 %v972_v60, %v968_v59 }
 0xcf2   :  { %976 = vrot.lane.b32.xlu0 %v974_v61, %s3285_s4 }
 0xd64   :  { %v977_v63 = vpop.permute.xlu0 %976 }
 0xd65   :  { %v979_v0 = vadd.f32 %v977_v63, %v969_v62 }
 0xd67   :  { %3119 = vtanh.f32 %v979_v0 }
 0xd71   :  { %v3120_v1 = vpop.eup %3119 }
 0xd72   :  { %982 = vrot.lane.b32.xlu1 %v3120_v1, %s3285_s4 }
 0xde4   :  { %v983_v3 = vpop.permute.xlu1 %982 }
 0xde5   :  { %v985_v4 = vmul.f32 %v983_v3, %v968_v59 }
 0xde7   :  { %987 = vrot.lane.b32.xlu0 %v985_v4, %s3286_s25 }
 0xe59   :  { %v988_v5 = vpop.permute.xlu0 %987 }
 0xe5a   :  { %990 = vst.msk [vmem:[#allocation3 + $0x8] sm:$0x3] %vm573_vm3, %v988_v5  ;;  %2792 = vmatmul.mubr.msk.f32.vlgmr.msra.gmra.mrb[6].mxu1 %vm301_vm2, %v988_v5 }
 0xe5b   :  { %2993 = vmatpush3.bf16.msra.mxu1 %v3438_v18  ;;  %2813 = vmatprep.mubr.msk.f32.mxu1 %vm3283_vm1, %v3284_v13 }
 0xe5c   :  { %2994 = vmatprep.subr.bf16.mxu1 %v3282_v10 }
 0xe5f   :  { %2996 = vmatpush3.bf16.msra.mxu1 %v3450_v21 }
 0xe60   :  { %3003 = vmatprep.subr.bf16.mxu1 %v3282_v10 }
 0xf2d   :  { %v1060_v7 = vpop.f32.mrb[6].mxu1 }
 0xf2e   :  { %v1064_v8 = vadd.f32 %v1060_v7, %v991_v6  ;;  %v2793_v9 = vpop.f32.mrb[7].mxu1 }
 0xf30   :  { %v2566_v11 = vmul.f32 -1.442695, %v1064_v8 }
 0xf32   :  { %3121 = vpow2.f32 %v2566_v11  ;;  %v2574_v11 = vld [vmem:[%s3805_s9 + $0x2] sm:$0x3] }
 0xf33   :  { %3123 = vtanh.f32 %v1064_v8 }
 0xf3c   :  { %v3122_v12 = vpop.eup %3121 }
 0xf3d   :  { %v1068_v14 = vadd.f32 1.0, %v3122_v12  ;;  %v3124_v18 = vpop.eup %3123 }
 0xf3f   :  { %3125 = vrcp.f32 %v1068_v14  ;;  %v1199_v14 = vld [vmem:[#allocation4 + $0xe] sm:$0x3] }
 0xf49   :  { %v3126_v15 = vpop.eup %3125 }
 0xf4a   :  { %v1072_v16 = vsel %vm50_vm0, %v3126_v15, %v3124_v18 }
 0xf4b   :  { %1075 = vrot.lane.b32.xlu1 %v1072_v16, %s3285_s4  ;;  %v1073_v19 = vmul.f32 %v1072_v16, %v979_v0 }
 0xfbd   :  { %v1076_v21 = vpop.permute.xlu1 %1075 }
 0xfbe   :  { %v1078_v17 = vmul.f32 %v1076_v21, %v1072_v16 }
 0xfc0   :  { %1080 = vrot.lane.b32.xlu0 %v1078_v17, %s3285_s4 }
0x1032   :  { %v1081_v20 = vpop.permute.xlu0 %1080 }
0x1033   :  { %v3555_v22 = vadd.f32 %v1081_v20, %v1073_v19 }
0x1035   :  { %3127 = vtanh.f32 %v3555_v22 }
0x103f   :  { %v3128_v23 = vpop.eup %3127 }
0x1040   :  { %1086 = vrot.lane.b32.xlu1 %v3128_v23, %s3285_s4 }
0x10b2   :  { %v1087_v24 = vpop.permute.xlu1 %1086 }
0x10b3   :  { %v1089_v25 = vmul.f32 %v1087_v24, %v1072_v16 }
0x10b5   :  { %1091 = vrot.lane.b32.xlu0 %v1089_v25, %s3286_s25 }
0x1127   :  { %v1092_v31 = vpop.permute.xlu0 %1091 }
0x1128   :  { %1094 = vst.msk [vmem:[#allocation3 + $0xa] sm:$0x3] %vm573_vm3, %v1092_v31  ;;  %2803 = vmatmul.mubr.msk.f32.vlgmr.msra.gmra.mrb[8].mxu0 %vm301_vm2, %v1092_v31 }
0x1129   :  { %2999 = vmatpush3.bf16.msra.mxu0 %v3566_v28  ;;  %2824 = vmatprep.mubr.msk.f32.mxu0 %vm3283_vm1, %v3284_v13 }
0x112a   :  { %3000 = vmatprep.subr.bf16.mxu0 %v3282_v10 }
0x112d   :  { %3002 = vmatpush3.bf16.msra.mxu0 %v3577_v32 }
0x112e   :  { %3009 = vmatprep.subr.bf16.mxu0 %v3282_v10 }
0x1130   :  { %2825 = vmatmul.mubr.msk.f32.vlgmr.msra.gmra.mrb[10].mxu0 %vm301_vm2, %v1313_v38 }
0x1131   :  { %3011 = vmatpush3.bf16.msra.mxu0 %v3589_v35  ;;  %2846 = vmatprep.mubr.msk.f32.mxu0 %vm3283_vm1, %v3284_v13 }
0x1132   :  { %3012 = vmatprep.subr.bf16.mxu0 %v3282_v10 }
0x1135   :  { %3014 = vmatpush3.bf16.msra.mxu0 %v3600_v39 }
0x1136   :  { %3021 = vmatprep.subr.bf16.mxu0 %v3282_v10 }
0x1138   :  { %2847 = vmatmul.mubr.msk.f32.vlgmr.msra.gmra.mrb[12].mxu0 %vm301_vm2, %v2573_v40 }
0x1139   :  { %3023 = vmatpush3.bf16.msra.mxu0 %v3589_v35  ;;  %2868 = vmatprep.mubr.msk.f32.mxu0 %vm3283_vm1, %v3284_v13 }
0x113a   :  { %3024 = vmatprep.subr.bf16.mxu0 %v3282_v10 }
0x113d   :  { %3026 = vmatpush3.bf16.msra.mxu0 %v3600_v39 }
0x113e   :  { %3033 = vmatprep.subr.bf16.mxu0 %v3282_v10 }
0x11fb   :  { %v1164_v42 = vpop.f32.mrb[8].mxu0 }
0x11fc   :  { %v1168_v43 = vadd.f32 %v1164_v42, %v1095_v41  ;;  %v2804_v44 = vpop.f32.mrb[9].mxu0 }
0x11fe   :  { %v2568_v45 = vmul.f32 -1.442695, %v1168_v43 }
0x1200   :  { %3129 = vpow2.f32 %v2568_v45 }
0x1201   :  { %3131 = vtanh.f32 %v1168_v43 }
0x1203   :  { %v1394_v47 = vpop.f32.mrb[10].mxu0 }
0x1204   :  { %v1395_v48 = vadd.f32 %v3620_v46, %v1394_v47  ;;  %v2826_v49 = vpop.f32.mrb[11].mxu0 }
0x1206   :  { %1398 = vst [vmem:[#allocation4] sm:$0xff] %v1395_v48 }
0x120a   :  { %v3130_v50 = vpop.eup %3129 }
0x120b   :  { %v1172_v51 = vadd.f32 1.0, %v3130_v50  ;;  %v1559_v52 = vpop.f32.mrb[12].mxu0  ;;  %v3132_v54 = vpop.eup %3131 }
0x120c   :  { %v2848_v53 = vpop.f32.mrb[13].mxu0 }
0x120d   :  { %3133 = vrcp.f32 %v1172_v51  ;;  %v1489_v63 = vld [vmem:[#allocation4] sm:$0x3]  ;;  %v1593_v50 = vld [vmem:[#allocation4 + $0x2] sm:$0x3] }
0x120e   :  { %v1563_v0 = vadd.f32 %v1559_v52, %v1489_v63 }
0x1210   :  { %v2578_v1 = vmul.f32 -1.442695, %v1563_v0 }
0x1217   :  { %v3134_v55 = vpop.eup %3133 }
0x1218   :  { %v1176_v56 = vsel %vm50_vm0, %v3134_v55, %v3132_v54 }
0x1219   :  { %1179 = vrot.lane.b32.xlu1 %v1176_v56, %s3285_s4  ;;  %v1177_v59 = vmul.f32 %v1176_v56, %v3555_v22 }
0x128b   :  { %v1180_v57 = vpop.permute.xlu1 %1179 }
0x128c   :  { %v1182_v58 = vmul.f32 %v1180_v57, %v1176_v56 }
0x128e   :  { %1184 = vrot.lane.b32.xlu0 %v1182_v58, %s3285_s4 }
0x1300   :  { %v1185_v60 = vpop.permute.xlu0 %1184 }
0x1301   :  { %v1187_v61 = vadd.f32 %v1185_v60, %v1177_v59 }
0x1303   :  { %3135 = vtanh.f32 %v1187_v61 }
0x1304   :  { %3137 = vpow2.f32 %v2578_v1 }
0x130d   :  { %v3136_v62 = vpop.eup %3135 }
0x130e   :  { %1190 = vrot.lane.b32.xlu1 %v3136_v62, %s3285_s4  ;;  %v3138_v3 = vpop.eup %3137 }
0x130f   :  { %v1567_v4 = vadd.f32 1.0, %v3138_v3 }
0x1311   :  { %3139 = vrcp.f32 %v1567_v4 }
0x1312   :  { %3141 = vtanh.f32 %v1563_v0 }
0x131b   :  { %v3140_v7 = vpop.eup %3139 }
0x131c   :  { %v3142_v8 = vpop.eup %3141 }
0x131d   :  { %v1571_v9 = vsel %vm50_vm0, %v3140_v7, %v3142_v8 }
0x1380   :  { %v1191_v5 = vpop.permute.xlu1 %1190 }
0x1381   :  { %v1193_v6 = vmul.f32 %v1191_v5, %v1176_v56  ;;  %v1695_v5 = vld [vmem:[#allocation4 + $0x4] sm:$0x3] }
0x1383   :  { %1195 = vrot.lane.b32.xlu0 %v1193_v6, %s3286_s25 }
0x1387   :  { %1578 = vrot.lane.b32.xlu0 %v1571_v9, %s3285_s4 }
0x138b   :  { %1573 = vrot.lane.b32.xlu0 %v2574_v11, %s3285_s4 }
0x13f5   :  { %v1196_v12 = vpop.permute.xlu0 %1195 }
0x13f6   :  { %1198 = vst.msk [vmem:[#allocation3 + $0xc] sm:$0x3] %vm573_vm3, %v1196_v12  ;;  %2814 = vmatmul.mubr.msk.f32.vlgmr.msra.gmra.mrb[8].mxu1 %vm301_vm2, %v1196_v12 }
0x13f7   :  { %3005 = vmatpush3.bf16.msra.mxu1 %v3566_v28  ;;  %2835 = vmatprep.mubr.msk.f32.mxu1 %vm3283_vm1, %v3284_v13 }
0x13f8   :  { %3006 = vmatprep.subr.bf16.mxu1 %v3282_v10 }
0x13f9   :  { %v1579_v26 = vpop.permute.xlu0 %1578 }
0x13fa   :  { %v1581_v27 = vmul.f32 %v1579_v26, %v1571_v9  ;;  %v1797_v26 = vld [vmem:[#allocation4 + $0x6] sm:$0x3] }
0x13fb   :  { %3008 = vmatpush3.bf16.msra.mxu1 %v3577_v32 }
0x13fc   :  { %3015 = vmatprep.subr.bf16.mxu1 %v3282_v10 }
0x13fd   :  { %v1574_v29 = vpop.permute.xlu0 %1573 }
0x13fe   :  { %v1576_v32 = vmul.f32 %v1574_v29, %v1571_v9 }
0x14c9   :  { %v1268_v18 = vpop.f32.mrb[8].mxu1 }
0x14ca   :  { %v1272_v15 = vadd.f32 %v1268_v18, %v1199_v14  ;;  %v2815_v16 = vpop.f32.mrb[9].mxu1 }
0x14cc   :  { %v2570_v21 = vmul.f32 -1.442695, %v1272_v15 }
0x14ce   :  { %3143 = vpow2.f32 %v2570_v21 }
0x14cf   :  { %3145 = vtanh.f32 %v1272_v15 }
0x14d8   :  { %v3144_v17 = vpop.eup %3143 }
0x14d9   :  { %v1276_v19 = vadd.f32 1.0, %v3144_v17  ;;  %v3146_v20 = vpop.eup %3145 }
0x14db   :  { %3147 = vrcp.f32 %v1276_v19 }
0x14e5   :  { %v3148_v22 = vpop.eup %3147 }
0x14e6   :  { %v1280_v23 = vsel %vm50_vm0, %v3148_v22, %v3146_v20 }
0x14e7   :  { %1283 = vrot.lane.b32.xlu1 %v1280_v23, %s3285_s4  ;;  %v1281_v28 = vmul.f32 %v1280_v23, %v1187_v61 }
0x1559   :  { %v1284_v24 = vpop.permute.xlu1 %1283 }
0x155a   :  { %v1286_v25 = vmul.f32 %v1284_v24, %v1280_v23 }
0x155c   :  { %1288 = vrot.lane.b32.xlu1 %v1286_v25, %s3285_s4 }
0x1560   :  { %1583 = vrot.lane.b32.xlu1 %v1581_v27, %s3285_s4 }
0x15ce   :  { %v1289_v30 = vpop.permute.xlu1 %1288 }
0x15cf   :  { %v3650_v31 = vadd.f32 %v1289_v30, %v1281_v28 }
0x15d1   :  { %3149 = vtanh.f32 %v3650_v31 }
0x15d2   :  { %v1584_v33 = vpop.permute.xlu1 %1583 }
0x15d3   :  { %v1586_v34 = vadd.f32 %v1584_v33, %v1576_v32 }
0x15d5   :  { %3151 = vtanh.f32 %v1586_v34 }
0x15db   :  { %v3150_v36 = vpop.eup %3149 }
0x15dc   :  { %1294 = vrot.lane.b32.xlu0 %v3150_v36, %s3285_s4 }
0x15df   :  { %v3152_v37 = vpop.eup %3151 }
0x15e0   :  { %1589 = vrot.lane.b32.xlu1 %v3152_v37, %s3285_s4 }
0x164e   :  { %v1295_v38 = vpop.permute.xlu0 %1294 }
0x164f   :  { %v1297_v40 = vmul.f32 %v1295_v38, %v1280_v23 }
0x1651   :  { %1299 = vrot.lane.b32.xlu0 %v1297_v40, %s3286_s25 }
0x1652   :  { %v1590_v41 = vpop.permute.xlu1 %1589 }
0x1653   :  { %v1592_v42 = vmul.f32 %v1590_v41, %v1571_v9 }
0x1655   :  { %1595 = vrot.lane.b32.xlu1 %v1592_v42, %s3286_s25 }
0x16c3   :  { %v1300_v43 = vpop.permute.xlu0 %1299 }
0x16c4   :  { %1302 = vst.msk [vmem:[#allocation3 + $0xe] sm:$0x3] %vm573_vm3, %v1300_v43  ;;  %1303 = vst.msk [vmem:[#allocation9] sm:$0x3] %vm573_vm3, %v1300_v43 }
0x16c7   :  { %v1596_v45 = vpop.permute.xlu1 %1595 }
0x16cb   :  { %v1403_v44 = vld [vmem:[#allocation3 + $0x8] sm:$0xff] }
0x16cc   :  { %2836 = vmatmul.mubr.msk.f32.vlgmr.msra.gmra.mrb[10].mxu1 %vm301_vm2, %v1403_v44 }
0x16cd   :  { %3017 = vmatpush3.bf16.msra.mxu1 %v3589_v35  ;;  %2857 = vmatprep.mubr.msk.f32.mxu1 %vm3283_vm1, %v3284_v13 }
0x16ce   :  { %3018 = vmatprep.subr.bf16.mxu1 %v3282_v10 }
0x16d1   :  { %3020 = vmatpush3.bf16.msra.mxu1 %v3600_v39 }
0x16d2   :  { %3027 = vmatprep.subr.bf16.mxu1 %v3282_v10 }
0x16d4   :  { %2858 = vmatmul.mubr.msk.f32.vlgmr.msra.gmra.mrb[12].mxu1 %vm301_vm2, %v1596_v45 }
0x16d5   :  { %3029 = vmatpush3.bf16.msra.mxu1 %v3589_v35  ;;  %2879 = vmatprep.mubr.msk.f32.mxu1 %vm3283_vm1, %v3284_v13 }
0x16d6   :  { %3030 = vmatprep.subr.bf16.mxu1 %v3282_v10 }
0x16d9   :  { %3032 = vmatpush3.bf16.msra.mxu1 %v3600_v39 }
0x16da   :  { %3039 = vmatprep.subr.bf16.mxu1 %v3282_v10 }
0x179f   :  { %v1484_v47 = vpop.f32.mrb[10].mxu1 }
0x17a0   :  { %v1485_v48 = vadd.f32 %v3620_v46, %v1484_v47  ;;  %v2837_v49 = vpop.f32.mrb[11].mxu1 }
0x17a2   :  { %1488 = vst [vmem:[#allocation4 + $0x8] sm:$0xff] %v1485_v48 }
0x17a7   :  { %v1665_v51 = vpop.f32.mrb[12].mxu1 }
0x17a8   :  { %v1669_v52 = vadd.f32 %v1665_v51, %v1593_v50  ;;  %v2859_v53 = vpop.f32.mrb[13].mxu1 }
0x17a9   :  { %v1899_v49 = vld [vmem:[#allocation4 + $0x8] sm:$0x3] }
0x17aa   :  { %v2580_v54 = vmul.f32 -1.442695, %v1669_v52 }
0x17ac   :  { %3153 = vpow2.f32 %v2580_v54 }
0x17ad   :  { %3155 = vtanh.f32 %v1669_v52 }
0x17b6   :  { %v3154_v55 = vpop.eup %3153 }
0x17b7   :  { %v1673_v56 = vadd.f32 1.0, %v3154_v55  ;;  %v3156_v57 = vpop.eup %3155 }
0x17b9   :  { %3157 = vrcp.f32 %v1673_v56 }
0x17c3   :  { %v3158_v58 = vpop.eup %3157 }
0x17c4   :  { %v1677_v59 = vsel %vm50_vm0, %v3158_v58, %v3156_v57 }
0x17c5   :  { %1680 = vrot.lane.b32.xlu0 %v1677_v59, %s3285_s4  ;;  %v1678_v61 = vmul.f32 %v1677_v59, %v1586_v34 }
0x1837   :  { %v1681_v46 = vpop.permute.xlu0 %1680 }
0x1838   :  { %v1683_v60 = vmul.f32 %v1681_v46, %v1677_v59 }
0x183a   :  { %1685 = vrot.lane.b32.xlu1 %v1683_v60, %s3285_s4 }
0x18ac   :  { %v1686_v62 = vpop.permute.xlu1 %1685 }
0x18ad   :  { %v1688_v63 = vadd.f32 %v1686_v62, %v1678_v61 }
0x18af   :  { %3159 = vtanh.f32 %v1688_v63 }
0x18b9   :  { %v3160_v0 = vpop.eup %3159 }
0x18ba   :  { %1691 = vrot.lane.b32.xlu0 %v3160_v0, %s3285_s4 }
0x192c   :  { %v1692_v1 = vpop.permute.xlu0 %1691 }
0x192d   :  { %v1694_v3 = vmul.f32 %v1692_v1, %v1677_v59 }
0x192f   :  { %1697 = vrot.lane.b32.xlu1 %v1694_v3, %s3286_s25 }
0x19a1   :  { %v1698_v4 = vpop.permute.xlu1 %1697 }
0x19a2   :  { %2869 = vmatmul.mubr.msk.f32.vlgmr.msra.gmra.mrb[14].mxu0 %vm301_vm2, %v1698_v4  ;;  %v2001_v4 = vld [vmem:[#allocation4 + $0xa] sm:$0x3] }
0x19a3   :  { %3035 = vmatpush3.bf16.msra.mxu0 %v3589_v35  ;;  %2890 = vmatprep.mubr.msk.f32.mxu0 %vm3283_vm1, %v3284_v13 }
0x19a4   :  { %3036 = vmatprep.subr.bf16.mxu0 %v3282_v10 }
0x19a7   :  { %3038 = vmatpush3.bf16.msra.mxu0 %v3600_v39 }
0x19a8   :  { %3045 = vmatprep.subr.bf16.mxu0 %v3282_v10 }
0x1a75   :  { %v1767_v6 = vpop.f32.mrb[14].mxu0 }
0x1a76   :  { %v1771_v7 = vadd.f32 %v1767_v6, %v1695_v5  ;;  %v2870_v8 = vpop.f32.mrb[15].mxu0 }
0x1a78   :  { %v2582_v9 = vmul.f32 -1.442695, %v1771_v7 }
0x1a7a   :  { %3161 = vpow2.f32 %v2582_v9 }
0x1a7b   :  { %3163 = vtanh.f32 %v1771_v7 }
0x1a84   :  { %v3162_v11 = vpop.eup %3161 }
0x1a85   :  { %v1775_v12 = vadd.f32 1.0, %v3162_v11  ;;  %v3164_v14 = vpop.eup %3163 }
0x1a87   :  { %3165 = vrcp.f32 %v1775_v12 }
0x1a91   :  { %v3166_v18 = vpop.eup %3165 }
0x1a92   :  { %v1779_v15 = vsel %vm50_vm0, %v3166_v18, %v3164_v14 }
0x1a93   :  { %1782 = vrot.lane.b32.xlu0 %v1779_v15, %s3285_s4  ;;  %v1780_v17 = vmul.f32 %v1779_v15, %v1688_v63 }
0x1b05   :  { %v1783_v16 = vpop.permute.xlu0 %1782 }
0x1b06   :  { %v1785_v21 = vmul.f32 %v1783_v16, %v1779_v15 }
0x1b08   :  { %1787 = vrot.lane.b32.xlu1 %v1785_v21, %s3285_s4 }
0x1b7a   :  { %v1788_v19 = vpop.permute.xlu1 %1787 }
0x1b7b   :  { %v1790_v20 = vadd.f32 %v1788_v19, %v1780_v17 }
0x1b7d   :  { %3167 = vtanh.f32 %v1790_v20 }
0x1b87   :  { %v3168_v22 = vpop.eup %3167 }
0x1b88   :  { %1793 = vrot.lane.b32.xlu0 %v3168_v22, %s3285_s4 }
0x1bfa   :  { %v1794_v23 = vpop.permute.xlu0 %1793 }
0x1bfb   :  { %v1796_v24 = vmul.f32 %v1794_v23, %v1779_v15  ;;  %v2103_v23 = vld [vmem:[#allocation4 + $0xc] sm:$0x3] }
0x1bfd   :  { %1799 = vrot.lane.b32.xlu1 %v1796_v24, %s3286_s25 }
0x1c6f   :  { %v1800_v25 = vpop.permute.xlu1 %1799 }
0x1c70   :  { %2880 = vmatmul.mubr.msk.f32.vlgmr.msra.gmra.mrb[14].mxu1 %vm301_vm2, %v1800_v25 }
0x1c71   :  { %3041 = vmatpush3.bf16.msra.mxu1 %v3589_v35  ;;  %2901 = vmatprep.mubr.msk.f32.mxu1 %vm3283_vm1, %v3284_v13 }
0x1c72   :  { %3042 = vmatprep.subr.bf16.mxu1 %v3282_v10 }
0x1c75   :  { %3044 = vmatpush3.bf16.msra.mxu1 %v3600_v39 }
0x1c76   :  { %3051 = vmatprep.subr.bf16.mxu1 %v3282_v10 }
0x1d43   :  { %v1869_v27 = vpop.f32.mrb[14].mxu1 }
0x1d44   :  { %v1873_v28 = vadd.f32 %v1869_v27, %v1797_v26  ;;  %v2881_v29 = vpop.f32.mrb[15].mxu1 }
0x1d46   :  { %v2584_v30 = vmul.f32 -1.442695, %v1873_v28 }
0x1d48   :  { %3169 = vpow2.f32 %v2584_v30 }
0x1d49   :  { %3171 = vtanh.f32 %v1873_v28 }
0x1d52   :  { %v3170_v32 = vpop.eup %3169 }
0x1d53   :  { %v1877_v33 = vadd.f32 1.0, %v3170_v32  ;;  %v3172_v34 = vpop.eup %3171 }
0x1d55   :  { %3173 = vrcp.f32 %v1877_v33 }
0x1d5f   :  { %v3174_v36 = vpop.eup %3173 }
0x1d60   :  { %v1881_v37 = vsel %vm50_vm0, %v3174_v36, %v3172_v34 }
0x1d61   :  { %1884 = vrot.lane.b32.xlu0 %v1881_v37, %s3285_s4  ;;  %v1882_v41 = vmul.f32 %v1881_v37, %v1790_v20 }
0x1dd3   :  { %v1885_v38 = vpop.permute.xlu0 %1884 }
0x1dd4   :  { %v1887_v40 = vmul.f32 %v1885_v38, %v1881_v37 }
0x1dd6   :  { %1889 = vrot.lane.b32.xlu1 %v1887_v40, %s3285_s4 }
0x1e48   :  { %v1890_v42 = vpop.permute.xlu1 %1889 }
0x1e49   :  { %v1892_v43 = vadd.f32 %v1890_v42, %v1882_v41 }
0x1e4b   :  { %3175 = vtanh.f32 %v1892_v43 }
0x1e55   :  { %v3176_v44 = vpop.eup %3175 }
0x1e56   :  { %1895 = vrot.lane.b32.xlu0 %v3176_v44, %s3285_s4  ;;  %v2205_v44 = vld [vmem:[#allocation4 + $0xe] sm:$0x3] }
0x1ec8   :  { %v1896_v45 = vpop.permute.xlu0 %1895 }
0x1ec9   :  { %v1898_v47 = vmul.f32 %v1896_v45, %v1881_v37 }
0x1ecb   :  { %1901 = vrot.lane.b32.xlu1 %v1898_v47, %s3286_s25 }
0x1f3d   :  { %v1902_v48 = vpop.permute.xlu1 %1901 }
0x1f3e   :  { %2891 = vmatmul.mubr.msk.f32.vlgmr.msra.gmra.mrb[16].mxu0 %vm301_vm2, %v1902_v48 }
0x1f3f   :  { %3047 = vmatpush3.bf16.msra.mxu0 %v3589_v35  ;;  %2912 = vmatprep.mubr.msk.f32.mxu0 %vm3283_vm1, %v3284_v13 }
0x1f40   :  { %3048 = vmatprep.subr.bf16.mxu0 %v3282_v10 }
0x1f43   :  { %3050 = vmatpush3.bf16.msra.mxu0 %v3600_v39 }
0x1f44   :  { %3057 = vmatprep.subr.bf16.mxu0 %v3282_v10 }
0x2011   :  { %v1971_v50 = vpop.f32.mrb[16].mxu0 }
0x2012   :  { %v1975_v51 = vadd.f32 %v1971_v50, %v1899_v49  ;;  %v2892_v52 = vpop.f32.mrb[17].mxu0 }
0x2014   :  { %v2586_v53 = vmul.f32 -1.442695, %v1975_v51 }
0x2016   :  { %3177 = vpow2.f32 %v2586_v53 }
0x2017   :  { %3179 = vtanh.f32 %v1975_v51 }
0x2020   :  { %v3178_v54 = vpop.eup %3177 }
0x2021   :  { %v1979_v55 = vadd.f32 1.0, %v3178_v54  ;;  %v3180_v56 = vpop.eup %3179 }
0x2023   :  { %3181 = vrcp.f32 %v1979_v55 }
0x202d   :  { %v3182_v57 = vpop.eup %3181 }
0x202e   :  { %v1983_v58 = vsel %vm50_vm0, %v3182_v57, %v3180_v56 }
0x202f   :  { %1986 = vrot.lane.b32.xlu0 %v1983_v58, %s3285_s4  ;;  %v1984_v60 = vmul.f32 %v1983_v58, %v1892_v43 }
0x20a1   :  { %v1987_v59 = vpop.permute.xlu0 %1986 }
0x20a2   :  { %v1989_v46 = vmul.f32 %v1987_v59, %v1983_v58 }
0x20a4   :  { %1991 = vrot.lane.b32.xlu1 %v1989_v46, %s3285_s4  ;;  %v2319_v46 = vld [vmem:[%s3806_s10] sm:$0xff] }
0x2116   :  { %v1992_v61 = vpop.permute.xlu1 %1991 }
0x2117   :  { %v1994_v62 = vadd.f32 %v1992_v61, %v1984_v60  ;;  %v2320_v60 = vld [vmem:[%s3806_s10 + $0x8] sm:$0xff] }
0x2118   :  { %v3058_v61 = vpack.c.bf16 %v2320_v60, %v2319_v46 }
0x2119   :  { %3183 = vtanh.f32 %v1994_v62 }
0x2123   :  { %v3184_v63 = vpop.eup %3183 }
0x2124   :  { %1997 = vrot.lane.b32.xlu0 %v3184_v63, %s3285_s4 }
0x2196   :  { %v1998_v0 = vpop.permute.xlu0 %1997 }
0x2197   :  { %v2000_v1 = vmul.f32 %v1998_v0, %v1983_v58 }
0x2199   :  { %2003 = vrot.lane.b32.xlu1 %v2000_v1, %s3286_s25 }
0x220b   :  { %v2004_v3 = vpop.permute.xlu1 %2003 }
0x220c   :  { %2902 = vmatmul.mubr.msk.f32.vlgmr.msra.gmra.mrb[16].mxu1 %vm301_vm2, %v2004_v3 }
0x220d   :  { %3053 = vmatpush3.bf16.msra.mxu1 %v3589_v35  ;;  %2923 = vmatprep.mubr.msk.f32.mxu1 %vm3283_vm1, %v3284_v13 }
0x220e   :  { %3054 = vmatprep.subr.bf16.mxu1 %v3282_v10 }
0x2211   :  { %3056 = vmatpush3.bf16.msra.mxu1 %v3600_v39 }
0x22df   :  { %v2073_v5 = vpop.f32.mrb[16].mxu1 }
0x22e0   :  { %v2077_v6 = vadd.f32 %v2073_v5, %v2001_v4  ;;  %v2903_v7 = vpop.f32.mrb[17].mxu1 }
0x22e2   :  { %v2588_v8 = vmul.f32 -1.442695, %v2077_v6 }
0x22e4   :  { %3185 = vpow2.f32 %v2588_v8 }
0x22e5   :  { %3187 = vtanh.f32 %v2077_v6 }
0x22ee   :  { %v3186_v9 = vpop.eup %3185 }
0x22ef   :  { %v2081_v11 = vadd.f32 1.0, %v3186_v9  ;;  %v3188_v12 = vpop.eup %3187 }
0x22f1   :  { %3189 = vrcp.f32 %v2081_v11 }
0x22fb   :  { %v3190_v14 = vpop.eup %3189 }
0x22fc   :  { %v2085_v35 = vsel %vm50_vm0, %v3190_v14, %v3188_v12 }
0x22fd   :  { %2088 = vrot.lane.b32.xlu0 %v2085_v35, %s3285_s4  ;;  %v2086_v39 = vmul.f32 %v2085_v35, %v1994_v62  ;;  %v2322_v62 = vld [vmem:[%s3806_s10 + $0x18] sm:$0xff]  ;;  %s3288_s10 = smov [#allocation9]  }
0x22fe   :  { %v3061_v63 = vpack.c.bf16 %v2322_v62, %v2321_v2  ;;  %s2411_s21 = sshll.u32 %s3288_s10, 4  ;;  %s2412_s21 = int_to_ptr.vmem [resolvable:$true] %s2411_s21 }
0x22ff   :  { %s3219_s28 = scalar_lea.vmem %s2412_s21, 64  ;;  %p3224_p7 = scmp.lt.s32.totalorder %s2412_s21, %s2412_s21 }
0x2300   :  { %p3220_p6 = scmp.ne.s32.totalorder %s2412_s21, %s3219_s28  ;;  %p3225_p8 = scmp.lt.s32.totalorder %s3219_s28, %s3219_s28 }
0x2302   :  { %p3226_p9 = por %p3225_p8, %p3224_p7 }
0x2304   :  { %p3227_p10 = pnand %p3226_p9, %p3220_p6 }
0x236f   :  { %v2089_v18 = vpop.permute.xlu0 %2088 }
0x2370   :  { %v2091_v15 = vmul.f32 %v2089_v18, %v2085_v35 }
0x2372   :  { %2093 = vrot.lane.b32.xlu1 %v2091_v15, %s3285_s4 }
0x23e4   :  { %v2094_v16 = vpop.permute.xlu1 %2093 }
0x23e5   :  { %v2096_v21 = vadd.f32 %v2094_v16, %v2086_v39 }
0x23e7   :  { %3191 = vtanh.f32 %v2096_v21 }
0x23f1   :  { %v3192_v17 = vpop.eup %3191 }
0x23f2   :  { %2099 = vrot.lane.b32.xlu0 %v3192_v17, %s3285_s4 }
0x2464   :  { %v2100_v19 = vpop.permute.xlu0 %2099 }
0x2465   :  { %v2102_v20 = vmul.f32 %v2100_v19, %v2085_v35 }
0x2467   :  { %2105 = vrot.lane.b32.xlu1 %v2102_v20, %s3286_s25 }
0x24d9   :  { %v2106_v22 = vpop.permute.xlu1 %2105 }
0x24da   :  { %2913 = vmatmul.mubr.msk.f32.vlgmr.msra.gmra.mrb[18].mxu0 %vm301_vm2, %v2106_v22 }
0x24db   :  { %2934 = vmatprep.mubr.msk.f32.mxu0 %vm3283_vm1, %v3284_v13  ;;  %3059 = vmatpush3.bf16.msra.mxu0 %v3058_v61 }
0x24dc   :  { %3060 = vmatprep.subr.bf16.mxu0 %v3282_v10 }
0x24df   :  { %3062 = vmatpush3.bf16.msra.mxu0 %v3061_v63 }
0x25ad   :  { %v2175_v24 = vpop.f32.mrb[18].mxu0 }
0x25ae   :  { %v2179_v25 = vadd.f32 %v2175_v24, %v2103_v23  ;;  %v2914_v26 = vpop.f32.mrb[19].mxu0 }
0x25b0   :  { %v2590_v27 = vmul.f32 -1.442695, %v2179_v25 }
0x25b2   :  { %3193 = vpow2.f32 %v2590_v27 }
0x25b3   :  { %3195 = vtanh.f32 %v2179_v25 }
0x25bc   :  { %v3194_v28 = vpop.eup %3193 }
0x25bd   :  { %v2183_v29 = vadd.f32 1.0, %v3194_v28  ;;  %v3196_v30 = vpop.eup %3195 }
0x25bf   :  { %3197 = vrcp.f32 %v2183_v29 }
0x25c9   :  { %v3198_v32 = vpop.eup %3197 }
0x25ca   :  { %v2187_v33 = vsel %vm50_vm0, %v3198_v32, %v3196_v30 }
0x25cb   :  { %2190 = vrot.lane.b32.xlu0 %v2187_v33, %s3285_s4  ;;  %v2188_v13 = vmul.f32 %v2187_v33, %v2096_v21 }
0x263d   :  { %v2191_v34 = vpop.permute.xlu0 %2190 }
0x263e   :  { %v2193_v36 = vmul.f32 %v2191_v34, %v2187_v33 }
0x2640   :  { %2195 = vrot.lane.b32.xlu1 %v2193_v36, %s3285_s4 }
0x26b2   :  { %v2196_v37 = vpop.permute.xlu1 %2195 }
0x26b3   :  { %v2198_v38 = vadd.f32 %v2196_v37, %v2188_v13 }
0x26b5   :  { %3199 = vtanh.f32 %v2198_v38 }
0x26bf   :  { %v3200_v40 = vpop.eup %3199 }
0x26c0   :  { %2201 = vrot.lane.b32.xlu0 %v3200_v40, %s3285_s4 }
0x2732   :  { %v2202_v41 = vpop.permute.xlu0 %2201 }
0x2733   :  { %v2204_v42 = vmul.f32 %v2202_v41, %v2187_v33 }
0x2735   :  { %2207 = vrot.lane.b32.xlu1 %v2204_v42, %s3286_s25 }
0x27a7   :  { %v2208_v43 = vpop.permute.xlu1 %2207 }
0x27a8   :  { %2924 = vmatmul.mubr.msk.f32.vlgmr.msra.gmra.mrb[18].mxu1 %vm301_vm2, %v2208_v43 }
0x287b   :  { %v2277_v45 = vpop.f32.mrb[18].mxu1 }
0x287c   :  { %v2281_v47 = vadd.f32 %v2277_v45, %v2205_v44  ;;  %v2925_v48 = vpop.f32.mrb[19].mxu1 }
0x287e   :  { %v2592_v49 = vmul.f32 -1.442695, %v2281_v47 }
0x2880   :  { %3201 = vpow2.f32 %v2592_v49 }
0x2881   :  { %3203 = vtanh.f32 %v2281_v47 }
0x288a   :  { %v3202_v50 = vpop.eup %3201 }
0x288b   :  { %v2285_v51 = vadd.f32 1.0, %v3202_v50  ;;  %v3204_v52 = vpop.eup %3203 }
0x288d   :  { %3205 = vrcp.f32 %v2285_v51 }
0x2897   :  { %v3206_v53 = vpop.eup %3205 }
0x2898   :  { %v2289_v54 = vsel %vm50_vm0, %v3206_v53, %v3204_v52 }
0x2899   :  { %2292 = vrot.lane.b32.xlu0 %v2289_v54, %s3285_s4  ;;  %v2290_v57 = vmul.f32 %v2289_v54, %v2198_v38 }
0x290b   :  { %v2293_v55 = vpop.permute.xlu0 %2292 }
0x290c   :  { %v2295_v56 = vmul.f32 %v2293_v55, %v2289_v54 }
0x290e   :  { %2297 = vrot.lane.b32.xlu1 %v2295_v56, %s3285_s4 }
0x2980   :  { %v2298_v58 = vpop.permute.xlu1 %2297 }
0x2981   :  { %v2300_v59 = vadd.f32 %v2298_v58, %v2290_v57 }
0x2983   :  { %3207 = vtanh.f32 %v2300_v59 }
0x298d   :  { %v3208_v0 = vpop.eup %3207 }
0x298e   :  { %2303 = vrot.lane.b32.xlu0 %v3208_v0, %s3285_s4 }
0x2992   :  { %1305 = vrot.lane.b32.xlu0 %v3650_v31, %s3287_s14 }
0x2a00   :  { %v2304_v1 = vpop.permute.xlu0 %2303 }
0x2a01   :  { %v2306_v3 = vmul.f32 %v2304_v1, %v2289_v54 }
0x2a03   :  { %2308 = vrot.lane.b32.xlu1 %v2306_v3, %s3286_s25 }
0x2a04   :  { %v1306_v4 = vpop.permute.xlu0 %1305 }
0x2a05   :  { %1308 = vst.msk [vmem:[#allocation11] sm:$0x3] %vm573_vm3, %v1306_v4 }
0x2a07   :  { %2314 = vrot.lane.b32.xlu1 %v2300_v59, %s3287_s14 }
0x2a75   :  { %v2309_v5 = vpop.permute.xlu1 %2308 }
0x2a76   :  { %2312 = vst.msk [vmem:[#allocation9 + $0x2] sm:$0x3] %vm573_vm3, %v2309_v5  ;;  %2935 = vmatmul.mubr.msk.f32.vlgmr.msra.gmra.mrb[20].mxu0 %vm301_vm2, %v2309_v5 }
0x2a79   :  { %v2315_v10 = vpop.permute.xlu1 %2314 }
0x2a7a   :  { %2318 = vst.msk [vmem:[#allocation11 + $0x2] sm:$0x3] %vm573_vm3, %v2315_v10 }
0x2a7b   :  { %3230 = shalt.err (!%p3227_p10)
}
0x2a7c   :  { %s3231_s18 = scalar_lea.hbm %s3808_s13, 64 }
0x2a7d   :  { %p3232_p11 = scmp.ne.s32.totalorder %s3808_s13, %s3231_s18  ;;  %p3235_p12 = scmp.lt.u32.totalorder %s3231_s18, %s3808_s13 }
0x2a7f   :  { %p3237_p13 = pnand %p3235_p12, %p3232_p11 }
0x2a81   :  { %3240 = shalt.err (!%p3237_p13)
}
0x2a82   :  { %s3290_s16 = smov 2   ;;  %s3241_s20 = scalar_lea.vmem %s2424_s11, 64 }
0x2a83   :  { %2417 = dma.vmem_to_hbm [thread:$0]  %s2412_s21, 64, %s3808_s13, [#allocation10], %s3285_s4, %s3285_s4, %s3290_s16  }
0x2a84   :  { %p3242_p0 = scmp.ne.s32.totalorder %s2424_s11, %s3241_s20  ;;  %p3246_p1 = scmp.lt.s32.totalorder %s2424_s11, %s2424_s11 }
0x2a85   :  { %p3247_p2 = scmp.lt.s32.totalorder %s3241_s20, %s3241_s20 }
0x2a87   :  { %p3248_p3 = por %p3247_p2, %p3246_p1 }
0x2a89   :  { %p3249_p4 = pnand %p3248_p3, %p3242_p0 }
0x2a8b   :  { %3252 = shalt.err (!%p3249_p4)
}
0x2a8c   :  { %s3815_s7 = sld [smem:[#allocation23_spill]] }
0x2a92   :  { %s3253_s22 = scalar_lea.hbm %s3815_s7, 64 }
0x2a93   :  { %p3254_p5 = scmp.ne.s32.totalorder %s3815_s7, %s3253_s22  ;;  %p3257_p6 = scmp.lt.u32.totalorder %s3253_s22, %s3815_s7 }
0x2a95   :  { %p3259_p7 = pnand %p3257_p6, %p3254_p5 }
0x2a97   :  { %3262 = shalt.err (!%p3259_p7)
}
0x2a98   :  { %2429 = dma.vmem_to_hbm [thread:$0]  %s2424_s11, 64, %s3815_s7, [#allocation12], %s3285_s4, %s3285_s4, %s3290_s16   ;;  %v2593_v31 = vld [vmem:[#allocation8] ss:$0 sm:$0xff]  ;;  %vm2402_vm4 = vcmask 1024  }
0x2a99   :  { %s3816_s12 = sld [smem:[#allocation22_spill]] }
0x2b49   :  { %v2398_v6 = vpop.f32.mrb[20].mxu0 }
0x2b4a   :  { %v2399_v7 = vadd.f32 %v2593_v31, %v2398_v6  ;;  %v2936_v8 = vpop.f32.mrb[21].mxu0 }
0x2b4c   :  { %2403 = vst.msk [vmem:[%s3816_s12] sm:$0x3] %vm2402_vm4, %v2399_v7 }
0x2b4d   :  { %3273 = dma.done.wait [#allocation10], 64  }
0x2b4e   :  { %3274 = vsyncadd [#allocation10], 4294967232 }
0x2b4f   :  { %3275 = dma.done.wait [#allocation12], 64  }
0x2b50   :  { %3276 = vsyncadd [#allocation12], 4294967232 }
0x2b51   :  { %2438 = vsyncpa [#allocation10], 1 }
0x2b52   :  { %2439 = vsyncpa [#allocation12], 1 }
0x2b53   :  { %2440 = vsyncmov [#allocation5] }
0x2b56   :  { %s2441_s14 = vpop.sfrf %2440 }
0x2b57   :  { %p2595_p8 = scmp.ne.s32.totalorder %s2441_s14, 0 }
0x2b59   :  { %2445 = shalt.err (%p2595_p8)  }
0x2b5a   :  { %2447 = vsyncmov [#allocation5 + $0x1] }
0x2b5d   :  { %s2448_s4 = vpop.sfrf %2447 }
0x2b5e   :  { %p2596_p9 = scmp.ne.s32.totalorder %s2448_s4, 0 }
0x2b60   :  { %2452 = shalt.err (%p2596_p9)  }
0x2b61   :  { %2454 = vsyncmov [#allocation5 + $0x2] }
0x2b64   :  { %s2455_s10 = vpop.sfrf %2454 }
0x2b65   :  { %p2597_p10 = scmp.ne.s32.totalorder %s2455_s10, 0 }
0x2b67   :  { %2459 = shalt.err (%p2597_p10)  }
0x2b68   :  { %2461 = vsyncmov [#allocation5 + $0x3] }
0x2b6b   :  { %s2462_s21 = vpop.sfrf %2461 }
0x2b6c   :  { %p2598_p11 = scmp.ne.s32.totalorder %s2462_s21, 0 }
0x2b6e   :  { %2466 = shalt.err (%p2598_p11)  }

</bundles_post_ra>
